<compile_context>
chip_gen: v7x
topology: tpu7x:2x2x1
jax: 0.10.0
libtpu: 0.0.40
codegen_flags: <defaults>
</compile_context>

<pallas_src>
import jax
import jax.numpy as jnp
from jax import lax
from jax.experimental import pallas as pl
from jax.experimental.pallas import tpu as pltpu

BN_EPS = 1e-5
NEG_SLOPE = 0.2


def _round_up(a, b):
    return (a + b - 1) // b * b


def _phys_bytes(shape, dtype):
    """Rough physical VMEM bytes for a block: last two dims padded to (8, 128)."""
    s = [int(d) for d in shape]
    if len(s) >= 2:
        s[-2] = _round_up(s[-2], 8)
    s[-1] = _round_up(s[-1], 128)
    n = 1
    for d in s:
        n *= d
    return n * jnp.dtype(dtype).itemsize


def _vmem_capacity_bytes():
    try:
        cap = int(pltpu.get_tpu_info().vmem_capacity_bytes)
        if cap > 0:
            return cap
    except Exception:
        pass
    return 64 * 1024 * 1024  # conservative default (v7x has 64 MiB per TensorCore)


def _footprint_bytes(th, wo, wp1, c, cout_pad, in_dtype, y_dtype):
    xb = _phys_bytes((1, 4, th + 1, wp1, c), in_dtype)      # packed input block
    yb = _phys_bytes((1, th * wo, cout_pad), y_dtype)       # pre-BN output block
    st = _phys_bytes((1, 2, cout_pad), jnp.float32)         # per-tile stats block
    wb = _phys_bytes((16, c, cout_pad), in_dtype)           # weights (grid-invariant)
    ac = _phys_bytes((th * wo, cout_pad), jnp.float32)      # accumulator scratch
    # in/out blocks are double-buffered by the BlockSpec pipeline; the constant-index
    # weight block is conservatively counted as double-buffered too.
    return 2 * (xb + yb + st + wb) + ac


def _choose_th(n, ho, wo, wp1, c, cout_pad, in_dtype, y_dtype, vmem_cap, th_max):
    """Largest divisor of Ho whose double-buffered footprint fits the VMEM budget."""
    budget = int(0.35 * vmem_cap)
    divs = [d for d in range(1, ho + 1) if ho % d == 0]
    if th_max is not None:
        limited = [d for d in divs if d <= th_max]
        divs = limited if limited else [1]
    fits = [d for d in divs
            if _footprint_bytes(d, wo, wp1, c, cout_pad, in_dtype, y_dtype) <= budget]
    th = max(fits) if fits else min(divs)
    # Keep >= 2 grid steps so a 2-TensorCore part (v7x) can shard the parallel grid.
    if n * (ho // th) < 2:
        smaller = [d for d in divs if d < th]
        if smaller:
            th = max(smaller)
    return th


# ---------- pass 1: LeakyReLU + conv (16 shifted MXU matmuls) + stable per-tile stats ----------
def _conv_stats_kernel(xb_ref, w_ref, y_ref, stats_ref, acc_ref):
    # xb_ref:    (1, 4, th+1, Wo+1, C)  raw padded input, parity-factored, with row halo
    # w_ref:     (16, C, Cout_pad)      conv weights, (kh*4+kw)-indexed
    # y_ref:     (1, th*Wo, Cout_pad)   pre-BN conv output (f32 or bf16)
    # stats_ref: (1, 2, Cout_pad)       [row sum, sum((y - tile_mean)^2)]
    # acc_ref:   (th*Wo, Cout_pad) f32  scratch accumulator
    th = xb_ref.shape[2] - 1
    wo = xb_ref.shape[3] - 1
    c = xb_ref.shape[4]

    acc_ref[...] = jnp.zeros_like(acc_ref)
    for kh in range(4):
        for kw in range(4):
            p = (kh % 2) * 2 + (kw % 2)
            a = xb_ref[0, p, kh // 2: kh // 2 + th, kw // 2: kw // 2 + wo, :]
            a = a.astype(jnp.float32)
            a = jnp.where(a > 0, a, NEG_SLOPE * a)               # LeakyReLU(0.2), VPU, f32
            a = a.astype(w_ref.dtype).reshape(th * wo, c)
            acc_ref[...] += jnp.dot(a, w_ref[kh * 4 + kw],       # MXU, f32 accumulation
                                    preferred_element_type=jnp.float32)

    acc = acc_ref[...]
    y_ref[0] = acc.astype(y_ref.dtype)

    # Numerically stable per-tile stats (combined with the ANOVA identity in the wrapper).
    inv_n = 1.0 / float(th * wo)
    s1 = jnp.sum(acc, axis=0, keepdims=True)                      # (1, Cout_pad)
    mu = s1 * inv_n
    m2 = jnp.sum((acc - mu) ** 2, axis=0, keepdims=True)          # (1, Cout_pad)
    stats_ref[0] = jnp.concatenate([s1, m2], axis=0)


def downsample_forward(x, conv_w, conv_b, bn_gamma, bn_beta,
                       *, use_bf16_matmul=False, th_max=None):
    """x: (N, C, H, W) f32. conv_w: (Cout, Cin, 4, 4). Returns (N, Cout, H//2, W//2) f32.

    NOTE: conv_b is accepted for API parity but dropped analytically — a per-channel
    constant added before *training-mode* BatchNorm cancels exactly in (y - mean)."""
    del conv_b
    N, C, H, W = x.shape
    if H % 2 or W % 2:
        raise ValueError("H and W must be even for stride-2 downsampling")
    Cout = conv_w.shape[0]
    Ho, Wo = H // 2, W // 2
    Hp1, Wp1 = Ho + 1, Wo + 1
    M = N * Ho * Wo
    Cout_pad = _round_up(Cout, 128)   # TODO(synk): 256 on 256-wide-MXU parts (v6e/v7x)

    in_dtype = jnp.bfloat16 if use_bf16_matmul else jnp.float32
    y_dtype = jnp.bfloat16 if use_bf16_matmul else jnp.float32

    vmem_cap = _vmem_capacity_bytes()
    th = _choose_th(N, Ho, Wo, Wp1, C, Cout_pad, in_dtype, y_dtype, vmem_cap, th_max)
    HB = Ho // th
    NB = N * HB
    fp = _footprint_bytes(th, Wo, Wp1, C, Cout_pad, in_dtype, y_dtype)
    # scoped-VMEM default is 16 MiB (v5e) / 32 MiB (v6e, v7x); raise it shape-aware.
    vmem_limit = int(max(32 << 20, min(int(0.9 * vmem_cap), 2 * fp + (8 << 20))))

    # --- prep (one fused XLA pass over x, ~|x| traffic): pad -> parity factor -> halo ---
    x_nhwc = jnp.transpose(x, (0, 2, 3, 1))
    xp = jnp.pad(x_nhwc, ((0, 0), (1, 1), (1, 1), (0, 0)))              # zero pad; leaky(0)=0
    # (N, 2*Hp1, 2*Wp1, C) -> (N, Hp1, 2, Wp1, 2, C) -> (N, 4, Hp1, Wp1, C), p = hpar*2 + wpar
    xp = xp.reshape(N, Hp1, 2, Wp1, 2, C).transpose(0, 2, 4, 1, 3, 5).reshape(N, 4, Hp1, Wp1, C)
    # per-tile row halo: block b needs prep rows [b*th, b*th + th + 1)
    idx = jnp.arange(HB)[:, None] * th + jnp.arange(th + 1)[None, :]    # (HB, th+1)
    xb = jnp.take(xp, idx, axis=2)                                      # (N, 4, HB, th+1, Wp1, C)
    xb = xb.transpose(0, 2, 1, 3, 4, 5).reshape(NB, 4, th + 1, Wp1, C).astype(in_dtype)

    # weights (Cout, C, 4, 4) -> (kh, kw, C, Cout) -> (16, C, Cout_pad)
    w = jnp.transpose(conv_w, (2, 3, 1, 0)).reshape(16, C, Cout)
    w = jnp.pad(w, ((0, 0), (0, 0), (0, Cout_pad - Cout))).astype(in_dtype)

    y, stats = pl.pallas_call(
        _conv_stats_kernel,
        out_shape=(jax.ShapeDtypeStruct((NB, th * Wo, Cout_pad), y_dtype),
                   jax.ShapeDtypeStruct((NB, 2, Cout_pad), jnp.float32)),
        grid=(NB,),
        in_specs=[
            pl.BlockSpec((1, 4, th + 1, Wp1, C), lambda i: (i, 0, 0, 0, 0)),
            pl.BlockSpec((16, C, Cout_pad), lambda i: (0, 0, 0)),        # grid-invariant
        ],
        out_specs=(
            pl.BlockSpec((1, th * Wo, Cout_pad), lambda i: (i, 0, 0)),   # lane-dense tile
            pl.BlockSpec((1, 2, Cout_pad), lambda i: (i, 0, 0)),
        ),
        scratch_shapes=[pltpu.VMEM((th * Wo, Cout_pad), jnp.float32)],
        compiler_params=pltpu.CompilerParams(
            dimension_semantics=("parallel",), vmem_limit_bytes=vmem_limit),
    )(xb, w)

    # --- tiny glue: exact stats combine + scale/shift fused by XLA with the NCHW transpose ---
    s1 = stats[:, 0, :]                                  # (NB, Cout_pad)
    m2 = stats[:, 1, :]
    n_t = float(th * Wo)
    mean = jnp.sum(s1, axis=0) / float(M)                # (Cout_pad,)
    mean_t = s1 / n_t
    var = (jnp.sum(m2, axis=0) + n_t * jnp.sum((mean_t - mean) ** 2, axis=0)) / float(M)
    var = jnp.maximum(var, 0.0)
    gamma_pad = jnp.pad(bn_gamma.astype(jnp.float32), (0, Cout_pad - Cout))
    beta_pad = jnp.pad(bn_beta.astype(jnp.float32), (0, Cout_pad - Cout))
    scale = gamma_pad * lax.rsqrt(var + BN_EPS)
    shift = beta_pad - mean * scale

    out = y.astype(jnp.float32) * scale + shift          # (NB, th*Wo, Cout_pad)
    out = out[:, :, :Cout].reshape(N, Ho, Wo, Cout).transpose(0, 3, 1, 2)
    return out


def _reference(x, conv_w, conv_b, bn_gamma, bn_beta):
    """Pure-JAX reference matching the PyTorch training-mode forward."""
    a = jnp.where(x > 0, x, NEG_SLOPE * x)
    y = lax.conv_general_dilated(
        a, conv_w, window_strides=(2, 2), padding=((1, 1), (1, 1)),
        dimension_numbers=("NCHW", "OIHW", "NCHW"),
    ) + conv_b[None, :, None, None]
    mean = jnp.mean(y, axis=(0, 2, 3), keepdims=True)
    var = jnp.mean((y - mean) ** 2, axis=(0, 2, 3), keepdims=True)
    y_hat = (y - mean) * lax.rsqrt(var + BN_EPS)
    return y_hat * bn_gamma[None, :, None, None] + bn_beta[None, :, None, None]


if __name__ == "__main__":
    # small shapes: batch=2, in_channels=4, spatial=16x16, out_channels=8
    N, Cin, H, W = 2, 4, 16, 16
    Cout = 8

    key = jax.random.PRNGKey(0)
    kx, kw, kb = jax.random.split(key, 3)

    x = jax.random.normal(kx, (N, Cin, H, W), dtype=jnp.float32)
    fan_in = Cin * 4 * 4
    conv_w = jax.random.normal(kw, (Cout, Cin, 4, 4), dtype=jnp.float32) * (1.0 / fan_in) ** 0.5
    conv_b = jax.random.normal(kb, (Cout,), dtype=jnp.float32) * 0.01
    bn_gamma = jnp.ones((Cout,), dtype=jnp.float32)   # PyTorch BN default weight
    bn_beta = jnp.zeros((Cout,), dtype=jnp.float32)   # PyTorch BN default bias

    ref = _reference(x, conv_w, conv_b, bn_gamma, bn_beta)
    fwd = jax.jit(downsample_forward, static_argnames=("use_bf16_matmul", "th_max"))

    # f32 path (single tile per image)
    out = jax.block_until_ready(fwd(x, conv_w, conv_b, bn_gamma, bn_beta))
    assert out.shape == (N, Cout, H // 2, W // 2)
    assert jnp.allclose(out, ref, atol=1e-4, rtol=1e-4)

    # f32 path forcing multiple row-tiles per image (exercises halo blocks + stats combine)
    out_t = jax.block_until_ready(fwd(x, conv_w, conv_b, bn_gamma, bn_beta, th_max=4))
    assert jnp.allclose(out_t, ref, atol=1e-4, rtol=1e-4)

    # bf16 MXU-operand + bf16 intermediate path (f32 accumulation + f32 BN) -> loose tolerance
    out_bf16 = jax.block_until_ready(
        fwd(x, conv_w, conv_b, bn_gamma, bn_beta, use_bf16_matmul=True))
    assert jnp.allclose(out_bf16, ref, atol=5e-2, rtol=5e-2)

    print("KERNEL_OK")
</pallas_src>

<mosaic_0001>
module attributes {stable_mosaic.version = 11 : i64} {
  func.func @_conv_stats_kernel(%arg0: i32, %arg1: memref<1x4x9x9x4xf32, #tpu.memory_space<vmem>>, %arg2: memref<16x4x128xf32, #tpu.memory_space<vmem>>, %arg3: memref<1x64x128xf32, #tpu.memory_space<vmem>>, %arg4: memref<1x2x128xf32, #tpu.memory_space<vmem>>, %arg5: memref<64x128xf32, #tpu.memory_space<vmem>>) attributes {dimension_semantics = [#tpu.dimension_semantics<parallel>], iteration_bounds = array<i64: 2>, scalar_prefetch = 0 : i64, scratch_operands = 1 : i64, tpu.core_type = #tpu.core_type<tc>, window_params = [{transform_indices = @transform_0, window_bounds = array<i64: 1, 4, 9, 9, 4>}, {pipeline_mode = #tpu.pipeline_mode<synchronous>, transform_indices = @transform_1, window_bounds = array<i64: 16, 4, 128>}, {transform_indices = @transform_2, window_bounds = array<i64: 1, 64, 128>}, {transform_indices = @transform_3, window_bounds = array<i64: 1, 2, 128>}]} {
    %cst = arith.constant 0.000000e+00 : f32
    %0 = vector.broadcast %cst : f32 to vector<64x128xf32>
    %c0 = arith.constant 0 : index
    %c0_0 = arith.constant 0 : index
    %1 = vector.load %arg5[%c0, %c0_0] : memref<64x128xf32, #tpu.memory_space<vmem>>, vector<64x128xf32>
    tpu.vector_store %arg5[%c0, %c0_0], %0 {strides = array<i32>} : memref<64x128xf32, #tpu.memory_space<vmem>>, vector<64x128xf32>,
    %c0_1 = arith.constant 0 : index
    %c0_2 = arith.constant 0 : index
    %c0_3 = arith.constant 0 : index
    %c0_4 = arith.constant 0 : index
    %c0_5 = arith.constant 0 : index
    %2 = vector.load %arg1[%c0_1, %c0_2, %c0_3, %c0_4, %c0_5] : memref<1x4x9x9x4xf32, #tpu.memory_space<vmem>>, vector<1x1x8x8x4xf32>
    %3 = vector.shape_cast %2 : vector<1x1x8x8x4xf32> to vector<8x8x4xf32>
    %cst_6 = arith.constant 0.000000e+00 : f32
    %4 = vector.broadcast %cst_6 : f32 to vector<8x8x4xf32>
    %5 = arith.cmpf ogt, %3, %4 : vector<8x8x4xf32>
    %cst_7 = arith.constant 2.000000e-01 : f32
    %6 = vector.broadcast %cst_7 : f32 to vector<8x8x4xf32>
    %7 = arith.mulf %6, %3 : vector<8x8x4xf32>
    %8 = arith.select %5, %3, %7 : vector<8x8x4xi1>, vector<8x8x4xf32>
    %9 = vector.shape_cast %8 : vector<8x8x4xf32> to vector<64x4xf32>
    %c0_8 = arith.constant 0 : index
    %c0_9 = arith.constant 0 : index
    %10 = vector.load %arg5[%c0_8, %c0_9] : memref<64x128xf32, #tpu.memory_space<vmem>>, vector<64x128xf32>
    %c0_10 = arith.constant 0 : index
    %c0_11 = arith.constant 0 : index
    %c0_12 = arith.constant 0 : index
    %11 = vector.load %arg2[%c0_10, %c0_11, %c0_12] : memref<16x4x128xf32, #tpu.memory_space<vmem>>, vector<1x4x128xf32>
    %12 = vector.shape_cast %11 : vector<1x4x128xf32> to vector<4x128xf32>
    %cst_13 = arith.constant dense<0.000000e+00> : vector<64x128xf32>
    %13 = tpu.matmul %9, %12, %cst_13 {dimension_numbers = #tpu.dot_dimension_numbers<[1], [0], [0], [1], [0, 0, 1, 1], [], []>} : vector<64x4xf32>, vector<4x128xf32>, vector<64x128xf32> -> vector<64x128xf32>
    %14 = arith.addf %10, %13 : vector<64x128xf32>
    %c0_14 = arith.constant 0 : index
    %c0_15 = arith.constant 0 : index
    %15 = vector.load %arg5[%c0_14, %c0_15] : memref<64x128xf32, #tpu.memory_space<vmem>>, vector<64x128xf32>
    tpu.vector_store %arg5[%c0_14, %c0_15], %14 {strides = array<i32>} : memref<64x128xf32, #tpu.memory_space<vmem>>, vector<64x128xf32>,
    %c0_16 = arith.constant 0 : index
    %c1 = arith.constant 1 : index
    %c0_17 = arith.constant 0 : index
    %c0_18 = arith.constant 0 : index
    %c0_19 = arith.constant 0 : index
    %16 = vector.load %arg1[%c0_16, %c1, %c0_17, %c0_18, %c0_19] : memref<1x4x9x9x4xf32, #tpu.memory_space<vmem>>, vector<1x1x8x8x4xf32>
    %17 = vector.shape_cast %16 : vector<1x1x8x8x4xf32> to vector<8x8x4xf32>
    %cst_20 = arith.constant 0.000000e+00 : f32
    %18 = vector.broadcast %cst_20 : f32 to vector<8x8x4xf32>
    %19 = arith.cmpf ogt, %17, %18 : vector<8x8x4xf32>
    %cst_21 = arith.constant 2.000000e-01 : f32
    %20 = vector.broadcast %cst_21 : f32 to vector<8x8x4xf32>
    %21 = arith.mulf %20, %17 : vector<8x8x4xf32>
    %22 = arith.select %19, %17, %21 : vector<8x8x4xi1>, vector<8x8x4xf32>
    %23 = vector.shape_cast %22 : vector<8x8x4xf32> to vector<64x4xf32>
    %c0_22 = arith.constant 0 : index
    %c0_23 = arith.constant 0 : index
    %24 = vector.load %arg5[%c0_22, %c0_23] : memref<64x128xf32, #tpu.memory_space<vmem>>, vector<64x128xf32>
    %c1_24 = arith.constant 1 : index
    %c0_25 = arith.constant 0 : index
    %c0_26 = arith.constant 0 : index
    %25 = vector.load %arg2[%c1_24, %c0_25, %c0_26] : memref<16x4x128xf32, #tpu.memory_space<vmem>>, vector<1x4x128xf32>
    %26 = vector.shape_cast %25 : vector<1x4x128xf32> to vector<4x128xf32>
    %cst_27 = arith.constant dense<0.000000e+00> : vector<64x128xf32>
    %27 = tpu.matmul %23, %26, %cst_27 {dimension_numbers = #tpu.dot_dimension_numbers<[1], [0], [0], [1], [0, 0, 1, 1], [], []>} : vector<64x4xf32>, vector<4x128xf32>, vector<64x128xf32> -> vector<64x128xf32>
    %28 = arith.addf %24, %27 : vector<64x128xf32>
    %c0_28 = arith.constant 0 : index
    %c0_29 = arith.constant 0 : index
    %29 = vector.load %arg5[%c0_28, %c0_29] : memref<64x128xf32, #tpu.memory_space<vmem>>, vector<64x128xf32>
    tpu.vector_store %arg5[%c0_28, %c0_29], %28 {strides = array<i32>} : memref<64x128xf32, #tpu.memory_space<vmem>>, vector<64x128xf32>,
    %c0_30 = arith.constant 0 : index
    %c0_31 = arith.constant 0 : index
    %c0_32 = arith.constant 0 : index
    %c1_33 = arith.constant 1 : index
    %c0_34 = arith.constant 0 : index
    %30 = vector.load %arg1[%c0_30, %c0_31, %c0_32, %c1_33, %c0_34] : memref<1x4x9x9x4xf32, #tpu.memory_space<vmem>>, vector<1x1x8x8x4xf32>
    %31 = vector.shape_cast %30 : vector<1x1x8x8x4xf32> to vector<8x8x4xf32>
    %cst_35 = arith.constant 0.000000e+00 : f32
    %32 = vector.broadcast %cst_35 : f32 to vector<8x8x4xf32>
    %33 = arith.cmpf ogt, %31, %32 : vector<8x8x4xf32>
    %cst_36 = arith.constant 2.000000e-01 : f32
    %34 = vector.broadcast %cst_36 : f32 to vector<8x8x4xf32>
    %35 = arith.mulf %34, %31 : vector<8x8x4xf32>
    %36 = arith.select %33, %31, %35 : vector<8x8x4xi1>, vector<8x8x4xf32>
    %37 = vector.shape_cast %36 : vector<8x8x4xf32> to vector<64x4xf32>
    %c0_37 = arith.constant 0 : index
    %c0_38 = arith.constant 0 : index
    %38 = vector.load %arg5[%c0_37, %c0_38] : memref<64x128xf32, #tpu.memory_space<vmem>>, vector<64x128xf32>
    %c2 = arith.constant 2 : index
    %c0_39 = arith.constant 0 : index
    %c0_40 = arith.constant 0 : index
    %39 = vector.load %arg2[%c2, %c0_39, %c0_40] : memref<16x4x128xf32, #tpu.memory_space<vmem>>, vector<1x4x128xf32>
    %40 = vector.shape_cast %39 : vector<1x4x128xf32> to vector<4x128xf32>
    %cst_41 = arith.constant dense<0.000000e+00> : vector<64x128xf32>
    %41 = tpu.matmul %37, %40, %cst_41 {dimension_numbers = #tpu.dot_dimension_numbers<[1], [0], [0], [1], [0, 0, 1, 1], [], []>} : vector<64x4xf32>, vector<4x128xf32>, vector<64x128xf32> -> vector<64x128xf32>
    %42 = arith.addf %38, %41 : vector<64x128xf32>
    %c0_42 = arith.constant 0 : index
    %c0_43 = arith.constant 0 : index
    %43 = vector.load %arg5[%c0_42, %c0_43] : memref<64x128xf32, #tpu.memory_space<vmem>>, vector<64x128xf32>
    tpu.vector_store %arg5[%c0_42, %c0_43], %42 {strides = array<i32>} : memref<64x128xf32, #tpu.memory_space<vmem>>, vector<64x128xf32>,
    %c0_44 = arith.constant 0 : index
    %c1_45 = arith.constant 1 : index
    %c0_46 = arith.constant 0 : index
    %c1_47 = arith.constant 1 : index
    %c0_48 = arith.constant 0 : index
    %44 = vector.load %arg1[%c0_44, %c1_45, %c0_46, %c1_47, %c0_48] : memref<1x4x9x9x4xf32, #tpu.memory_space<vmem>>, vector<1x1x8x8x4xf32>
    %45 = vector.shape_cast %44 : vector<1x1x8x8x4xf32> to vector<8x8x4xf32>
    %cst_49 = arith.constant 0.000000e+00 : f32
    %46 = vector.broadcast %cst_49 : f32 to vector<8x8x4xf32>
    %47 = arith.cmpf ogt, %45, %46 : vector<8x8x4xf32>
    %cst_50 = arith.constant 2.000000e-01 : f32
    %48 = vector.broadcast %cst_50 : f32 to vector<8x8x4xf32>
    %49 = arith.mulf %48, %45 : vector<8x8x4xf32>
    %50 = arith.select %47, %45, %49 : vector<8x8x4xi1>, vector<8x8x4xf32>
    %51 = vector.shape_cast %50 : vector<8x8x4xf32> to vector<64x4xf32>
    %c0_51 = arith.constant 0 : index
    %c0_52 = arith.constant 0 : index
    %52 = vector.load %arg5[%c0_51, %c0_52] : memref<64x128xf32, #tpu.memory_space<vmem>>, vector<64x128xf32>
    %c3 = arith.constant 3 : index
    %c0_53 = arith.constant 0 : index
    %c0_54 = arith.constant 0 : index
    %53 = vector.load %arg2[%c3, %c0_53, %c0_54] : memref<16x4x128xf32, #tpu.memory_space<vmem>>, vector<1x4x128xf32>
    %54 = vector.shape_cast %53 : vector<1x4x128xf32> to vector<4x128xf32>
    %cst_55 = arith.constant dense<0.000000e+00> : vector<64x128xf32>
    %55 = tpu.matmul %51, %54, %cst_55 {dimension_numbers = #tpu.dot_dimension_numbers<[1], [0], [0], [1], [0, 0, 1, 1], [], []>} : vector<64x4xf32>, vector<4x128xf32>, vector<64x128xf32> -> vector<64x128xf32>
    %56 = arith.addf %52, %55 : vector<64x128xf32>
    %c0_56 = arith.constant 0 : index
    %c0_57 = arith.constant 0 : index
    %57 = vector.load %arg5[%c0_56, %c0_57] : memref<64x128xf32, #tpu.memory_space<vmem>>, vector<64x128xf32>
    tpu.vector_store %arg5[%c0_56, %c0_57], %56 {strides = array<i32>} : memref<64x128xf32, #tpu.memory_space<vmem>>, vector<64x128xf32>,
    %c0_58 = arith.constant 0 : index
    %c2_59 = arith.constant 2 : index
    %c0_60 = arith.constant 0 : index
    %c0_61 = arith.constant 0 : index
    %c0_62 = arith.constant 0 : index
    %58 = vector.load %arg1[%c0_58, %c2_59, %c0_60, %c0_61, %c0_62] : memref<1x4x9x9x4xf32, #tpu.memory_space<vmem>>, vector<1x1x8x8x4xf32>
    %59 = vector.shape_cast %58 : vector<1x1x8x8x4xf32> to vector<8x8x4xf32>
    %cst_63 = arith.constant 0.000000e+00 : f32
    %60 = vector.broadcast %cst_63 : f32 to vector<8x8x4xf32>
    %61 = arith.cmpf ogt, %59, %60 : vector<8x8x4xf32>
    %cst_64 = arith.constant 2.000000e-01 : f32
    %62 = vector.broadcast %cst_64 : f32 to vector<8x8x4xf32>
    %63 = arith.mulf %62, %59 : vector<8x8x4xf32>
    %64 = arith.select %61, %59, %63 : vector<8x8x4xi1>, vector<8x8x4xf32>
    %65 = vector.shape_cast %64 : vector<8x8x4xf32> to vector<64x4xf32>
    %c0_65 = arith.constant 0 : index
    %c0_66 = arith.constant 0 : index
    %66 = vector.load %arg5[%c0_65, %c0_66] : memref<64x128xf32, #tpu.memory_space<vmem>>, vector<64x128xf32>
    %c4 = arith.constant 4 : index
    %c0_67 = arith.constant 0 : index
    %c0_68 = arith.constant 0 : index
    %67 = vector.load %arg2[%c4, %c0_67, %c0_68] : memref<16x4x128xf32, #tpu.memory_space<vmem>>, vector<1x4x128xf32>
    %68 = vector.shape_cast %67 : vector<1x4x128xf32> to vector<4x128xf32>
    %cst_69 = arith.constant dense<0.000000e+00> : vector<64x128xf32>
    %69 = tpu.matmul %65, %68, %cst_69 {dimension_numbers = #tpu.dot_dimension_numbers<[1], [0], [0], [1], [0, 0, 1, 1], [], []>} : vector<64x4xf32>, vector<4x128xf32>, vector<64x128xf32> -> vector<64x128xf32>
    %70 = arith.addf %66, %69 : vector<64x128xf32>
    %c0_70 = arith.constant 0 : index
    %c0_71 = arith.constant 0 : index
    %71 = vector.load %arg5[%c0_70, %c0_71] : memref<64x128xf32, #tpu.memory_space<vmem>>, vector<64x128xf32>
    tpu.vector_store %arg5[%c0_70, %c0_71], %70 {strides = array<i32>} : memref<64x128xf32, #tpu.memory_space<vmem>>, vector<64x128xf32>,
    %c0_72 = arith.constant 0 : index
    %c3_73 = arith.constant 3 : index
    %c0_74 = arith.constant 0 : index
    %c0_75 = arith.constant 0 : index
    %c0_76 = arith.constant 0 : index
    %72 = vector.load %arg1[%c0_72, %c3_73, %c0_74, %c0_75, %c0_76] : memref<1x4x9x9x4xf32, #tpu.memory_space<vmem>>, vector<1x1x8x8x4xf32>
    %73 = vector.shape_cast %72 : vector<1x1x8x8x4xf32> to vector<8x8x4xf32>
    %cst_77 = arith.constant 0.000000e+00 : f32
    %74 = vector.broadcast %cst_77 : f32 to vector<8x8x4xf32>
    %75 = arith.cmpf ogt, %73, %74 : vector<8x8x4xf32>
    %cst_78 = arith.constant 2.000000e-01 : f32
    %76 = vector.broadcast %cst_78 : f32 to vector<8x8x4xf32>
    %77 = arith.mulf %76, %73 : vector<8x8x4xf32>
    %78 = arith.select %75, %73, %77 : vector<8x8x4xi1>, vector<8x8x4xf32>
    %79 = vector.shape_cast %78 : vector<8x8x4xf32> to vector<64x4xf32>
    %c0_79 = arith.constant 0 : index
    %c0_80 = arith.constant 0 : index
    %80 = vector.load %arg5[%c0_79, %c0_80] : memref<64x128xf32, #tpu.memory_space<vmem>>, vector<64x128xf32>
    %c5 = arith.constant 5 : index
    %c0_81 = arith.constant 0 : index
    %c0_82 = arith.constant 0 : index
    %81 = vector.load %arg2[%c5, %c0_81, %c0_82] : memref<16x4x128xf32, #tpu.memory_space<vmem>>, vector<1x4x128xf32>
    %82 = vector.shape_cast %81 : vector<1x4x128xf32> to vector<4x128xf32>
    %cst_83 = arith.constant dense<0.000000e+00> : vector<64x128xf32>
    %83 = tpu.matmul %79, %82, %cst_83 {dimension_numbers = #tpu.dot_dimension_numbers<[1], [0], [0], [1], [0, 0, 1, 1], [], []>} : vector<64x4xf32>, vector<4x128xf32>, vector<64x128xf32> -> vector<64x128xf32>
    %84 = arith.addf %80, %83 : vector<64x128xf32>
    %c0_84 = arith.constant 0 : index
    %c0_85 = arith.constant 0 : index
    %85 = vector.load %arg5[%c0_84, %c0_85] : memref<64x128xf32, #tpu.memory_space<vmem>>, vector<64x128xf32>
    tpu.vector_store %arg5[%c0_84, %c0_85], %84 {strides = array<i32>} : memref<64x128xf32, #tpu.memory_space<vmem>>, vector<64x128xf32>,
    %c0_86 = arith.constant 0 : index
    %c2_87 = arith.constant 2 : index
    %c0_88 = arith.constant 0 : index
    %c1_89 = arith.constant 1 : index
    %c0_90 = arith.constant 0 : index
    %86 = vector.load %arg1[%c0_86, %c2_87, %c0_88, %c1_89, %c0_90] : memref<1x4x9x9x4xf32, #tpu.memory_space<vmem>>, vector<1x1x8x8x4xf32>
    %87 = vector.shape_cast %86 : vector<1x1x8x8x4xf32> to vector<8x8x4xf32>
    %cst_91 = arith.constant 0.000000e+00 : f32
    %88 = vector.broadcast %cst_91 : f32 to vector<8x8x4xf32>
    %89 = arith.cmpf ogt, %87, %88 : vector<8x8x4xf32>
    %cst_92 = arith.constant 2.000000e-01 : f32
    %90 = vector.broadcast %cst_92 : f32 to vector<8x8x4xf32>
    %91 = arith.mulf %90, %87 : vector<8x8x4xf32>
    %92 = arith.select %89, %87, %91 : vector<8x8x4xi1>, vector<8x8x4xf32>
    %93 = vector.shape_cast %92 : vector<8x8x4xf32> to vector<64x4xf32>
    %c0_93 = arith.constant 0 : index
    %c0_94 = arith.constant 0 : index
    %94 = vector.load %arg5[%c0_93, %c0_94] : memref<64x128xf32, #tpu.memory_space<vmem>>, vector<64x128xf32>
    %c6 = arith.constant 6 : index
    %c0_95 = arith.constant 0 : index
    %c0_96 = arith.constant 0 : index
    %95 = vector.load %arg2[%c6, %c0_95, %c0_96] : memref<16x4x128xf32, #tpu.memory_space<vmem>>, vector<1x4x128xf32>
    %96 = vector.shape_cast %95 : vector<1x4x128xf32> to vector<4x128xf32>
    %cst_97 = arith.constant dense<0.000000e+00> : vector<64x128xf32>
    %97 = tpu.matmul %93, %96, %cst_97 {dimension_numbers = #tpu.dot_dimension_numbers<[1], [0], [0], [1], [0, 0, 1, 1], [], []>} : vector<64x4xf32>, vector<4x128xf32>, vector<64x128xf32> -> vector<64x128xf32>
    %98 = arith.addf %94, %97 : vector<64x128xf32>
    %c0_98 = arith.constant 0 : index
    %c0_99 = arith.constant 0 : index
    %99 = vector.load %arg5[%c0_98, %c0_99] : memref<64x128xf32, #tpu.memory_space<vmem>>, vector<64x128xf32>
    tpu.vector_store %arg5[%c0_98, %c0_99], %98 {strides = array<i32>} : memref<64x128xf32, #tpu.memory_space<vmem>>, vector<64x128xf32>,
    %c0_100 = arith.constant 0 : index
    %c3_101 = arith.constant 3 : index
    %c0_102 = arith.constant 0 : index
    %c1_103 = arith.constant 1 : index
    %c0_104 = arith.constant 0 : index
    %100 = vector.load %arg1[%c0_100, %c3_101, %c0_102, %c1_103, %c0_104] : memref<1x4x9x9x4xf32, #tpu.memory_space<vmem>>, vector<1x1x8x8x4xf32>
    %101 = vector.shape_cast %100 : vector<1x1x8x8x4xf32> to vector<8x8x4xf32>
    %cst_105 = arith.constant 0.000000e+00 : f32
    %102 = vector.broadcast %cst_105 : f32 to vector<8x8x4xf32>
    %103 = arith.cmpf ogt, %101, %102 : vector<8x8x4xf32>
    %cst_106 = arith.constant 2.000000e-01 : f32
    %104 = vector.broadcast %cst_106 : f32 to vector<8x8x4xf32>
    %105 = arith.mulf %104, %101 : vector<8x8x4xf32>
    %106 = arith.select %103, %101, %105 : vector<8x8x4xi1>, vector<8x8x4xf32>
    %107 = vector.shape_cast %106 : vector<8x8x4xf32> to vector<64x4xf32>
    %c0_107 = arith.constant 0 : index
    %c0_108 = arith.constant 0 : index
    %108 = vector.load %arg5[%c0_107, %c0_108] : memref<64x128xf32, #tpu.memory_space<vmem>>, vector<64x128xf32>
    %c7 = arith.constant 7 : index
    %c0_109 = arith.constant 0 : index
    %c0_110 = arith.constant 0 : index
    %109 = vector.load %arg2[%c7, %c0_109, %c0_110] : memref<16x4x128xf32, #tpu.memory_space<vmem>>, vector<1x4x128xf32>
    %110 = vector.shape_cast %109 : vector<1x4x128xf32> to vector<4x128xf32>
    %cst_111 = arith.constant dense<0.000000e+00> : vector<64x128xf32>
    %111 = tpu.matmul %107, %110, %cst_111 {dimension_numbers = #tpu.dot_dimension_numbers<[1], [0], [0], [1], [0, 0, 1, 1], [], []>} : vector<64x4xf32>, vector<4x128xf32>, vector<64x128xf32> -> vector<64x128xf32>
    %112 = arith.addf %108, %111 : vector<64x128xf32>
    %c0_112 = arith.constant 0 : index
    %c0_113 = arith.constant 0 : index
    %113 = vector.load %arg5[%c0_112, %c0_113] : memref<64x128xf32, #tpu.memory_space<vmem>>, vector<64x128xf32>
    tpu.vector_store %arg5[%c0_112, %c0_113], %112 {strides = array<i32>} : memref<64x128xf32, #tpu.memory_space<vmem>>, vector<64x128xf32>,
    %c0_114 = arith.constant 0 : index
    %c0_115 = arith.constant 0 : index
    %c1_116 = arith.constant 1 : index
    %c0_117 = arith.constant 0 : index
    %c0_118 = arith.constant 0 : index
    %114 = vector.load %arg1[%c0_114, %c0_115, %c1_116, %c0_117, %c0_118] : memref<1x4x9x9x4xf32, #tpu.memory_space<vmem>>, vector<1x1x8x8x4xf32>
    %115 = vector.shape_cast %114 : vector<1x1x8x8x4xf32> to vector<8x8x4xf32>
    %cst_119 = arith.constant 0.000000e+00 : f32
    %116 = vector.broadcast %cst_119 : f32 to vector<8x8x4xf32>
    %117 = arith.cmpf ogt, %115, %116 : vector<8x8x4xf32>
    %cst_120 = arith.constant 2.000000e-01 : f32
    %118 = vector.broadcast %cst_120 : f32 to vector<8x8x4xf32>
    %119 = arith.mulf %118, %115 : vector<8x8x4xf32>
    %120 = arith.select %117, %115, %119 : vector<8x8x4xi1>, vector<8x8x4xf32>
    %121 = vector.shape_cast %120 : vector<8x8x4xf32> to vector<64x4xf32>
    %c0_121 = arith.constant 0 : index
    %c0_122 = arith.constant 0 : index
    %122 = vector.load %arg5[%c0_121, %c0_122] : memref<64x128xf32, #tpu.memory_space<vmem>>, vector<64x128xf32>
    %c8 = arith.constant 8 : index
    %c0_123 = arith.constant 0 : index
    %c0_124 = arith.constant 0 : index
    %123 = vector.load %arg2[%c8, %c0_123, %c0_124] : memref<16x4x128xf32, #tpu.memory_space<vmem>>, vector<1x4x128xf32>
    %124 = vector.shape_cast %123 : vector<1x4x128xf32> to vector<4x128xf32>
    %cst_125 = arith.constant dense<0.000000e+00> : vector<64x128xf32>
    %125 = tpu.matmul %121, %124, %cst_125 {dimension_numbers = #tpu.dot_dimension_numbers<[1], [0], [0], [1], [0, 0, 1, 1], [], []>} : vector<64x4xf32>, vector<4x128xf32>, vector<64x128xf32> -> vector<64x128xf32>
    %126 = arith.addf %122, %125 : vector<64x128xf32>
    %c0_126 = arith.constant 0 : index
    %c0_127 = arith.constant 0 : index
    %127 = vector.load %arg5[%c0_126, %c0_127] : memref<64x128xf32, #tpu.memory_space<vmem>>, vector<64x128xf32>
    tpu.vector_store %arg5[%c0_126, %c0_127], %126 {strides = array<i32>} : memref<64x128xf32, #tpu.memory_space<vmem>>, vector<64x128xf32>,
    %c0_128 = arith.constant 0 : index
    %c1_129 = arith.constant 1 : index
    %c1_130 = arith.constant 1 : index
    %c0_131 = arith.constant 0 : index
    %c0_132 = arith.constant 0 : index
    %128 = vector.load %arg1[%c0_128, %c1_129, %c1_130, %c0_131, %c0_132] : memref<1x4x9x9x4xf32, #tpu.memory_space<vmem>>, vector<1x1x8x8x4xf32>
    %129 = vector.shape_cast %128 : vector<1x1x8x8x4xf32> to vector<8x8x4xf32>
    %cst_133 = arith.constant 0.000000e+00 : f32
    %130 = vector.broadcast %cst_133 : f32 to vector<8x8x4xf32>
    %131 = arith.cmpf ogt, %129, %130 : vector<8x8x4xf32>
    %cst_134 = arith.constant 2.000000e-01 : f32
    %132 = vector.broadcast %cst_134 : f32 to vector<8x8x4xf32>
    %133 = arith.mulf %132, %129 : vector<8x8x4xf32>
    %134 = arith.select %131, %129, %133 : vector<8x8x4xi1>, vector<8x8x4xf32>
    %135 = vector.shape_cast %134 : vector<8x8x4xf32> to vector<64x4xf32>
    %c0_135 = arith.constant 0 : index
    %c0_136 = arith.constant 0 : index
    %136 = vector.load %arg5[%c0_135, %c0_136] : memref<64x128xf32, #tpu.memory_space<vmem>>, vector<64x128xf32>
    %c9 = arith.constant 9 : index
    %c0_137 = arith.constant 0 : index
    %c0_138 = arith.constant 0 : index
    %137 = vector.load %arg2[%c9, %c0_137, %c0_138] : memref<16x4x128xf32, #tpu.memory_space<vmem>>, vector<1x4x128xf32>
    %138 = vector.shape_cast %137 : vector<1x4x128xf32> to vector<4x128xf32>
    %cst_139 = arith.constant dense<0.000000e+00> : vector<64x128xf32>
    %139 = tpu.matmul %135, %138, %cst_139 {dimension_numbers = #tpu.dot_dimension_numbers<[1], [0], [0], [1], [0, 0, 1, 1], [], []>} : vector<64x4xf32>, vector<4x128xf32>, vector<64x128xf32> -> vector<64x128xf32>
    %140 = arith.addf %136, %139 : vector<64x128xf32>
    %c0_140 = arith.constant 0 : index
    %c0_141 = arith.constant 0 : index
    %141 = vector.load %arg5[%c0_140, %c0_141] : memref<64x128xf32, #tpu.memory_space<vmem>>, vector<64x128xf32>
    tpu.vector_store %arg5[%c0_140, %c0_141], %140 {strides = array<i32>} : memref<64x128xf32, #tpu.memory_space<vmem>>, vector<64x128xf32>,
    %c0_142 = arith.constant 0 : index
    %c0_143 = arith.constant 0 : index
    %c1_144 = arith.constant 1 : index
    %c1_145 = arith.constant 1 : index
    %c0_146 = arith.constant 0 : index
    %142 = vector.load %arg1[%c0_142, %c0_143, %c1_144, %c1_145, %c0_146] : memref<1x4x9x9x4xf32, #tpu.memory_space<vmem>>, vector<1x1x8x8x4xf32>
    %143 = vector.shape_cast %142 : vector<1x1x8x8x4xf32> to vector<8x8x4xf32>
    %cst_147 = arith.constant 0.000000e+00 : f32
    %144 = vector.broadcast %cst_147 : f32 to vector<8x8x4xf32>
    %145 = arith.cmpf ogt, %143, %144 : vector<8x8x4xf32>
    %cst_148 = arith.constant 2.000000e-01 : f32
    %146 = vector.broadcast %cst_148 : f32 to vector<8x8x4xf32>
    %147 = arith.mulf %146, %143 : vector<8x8x4xf32>
    %148 = arith.select %145, %143, %147 : vector<8x8x4xi1>, vector<8x8x4xf32>
    %149 = vector.shape_cast %148 : vector<8x8x4xf32> to vector<64x4xf32>
    %c0_149 = arith.constant 0 : index
    %c0_150 = arith.constant 0 : index
    %150 = vector.load %arg5[%c0_149, %c0_150] : memref<64x128xf32, #tpu.memory_space<vmem>>, vector<64x128xf32>
    %c10 = arith.constant 10 : index
    %c0_151 = arith.constant 0 : index
    %c0_152 = arith.constant 0 : index
    %151 = vector.load %arg2[%c10, %c0_151, %c0_152] : memref<16x4x128xf32, #tpu.memory_space<vmem>>, vector<1x4x128xf32>
    %152 = vector.shape_cast %151 : vector<1x4x128xf32> to vector<4x128xf32>
    %cst_153 = arith.constant dense<0.000000e+00> : vector<64x128xf32>
    %153 = tpu.matmul %149, %152, %cst_153 {dimension_numbers = #tpu.dot_dimension_numbers<[1], [0], [0], [1], [0, 0, 1, 1], [], []>} : vector<64x4xf32>, vector<4x128xf32>, vector<64x128xf32> -> vector<64x128xf32>
    %154 = arith.addf %150, %153 : vector<64x128xf32>
    %c0_154 = arith.constant 0 : index
    %c0_155 = arith.constant 0 : index
    %155 = vector.load %arg5[%c0_154, %c0_155] : memref<64x128xf32, #tpu.memory_space<vmem>>, vector<64x128xf32>
    tpu.vector_store %arg5[%c0_154, %c0_155], %154 {strides = array<i32>} : memref<64x128xf32, #tpu.memory_space<vmem>>, vector<64x128xf32>,
    %c0_156 = arith.constant 0 : index
    %c1_157 = arith.constant 1 : index
    %c1_158 = arith.constant 1 : index
    %c1_159 = arith.constant 1 : index
    %c0_160 = arith.constant 0 : index
    %156 = vector.load %arg1[%c0_156, %c1_157, %c1_158, %c1_159, %c0_160] : memref<1x4x9x9x4xf32, #tpu.memory_space<vmem>>, vector<1x1x8x8x4xf32>
    %157 = vector.shape_cast %156 : vector<1x1x8x8x4xf32> to vector<8x8x4xf32>
    %cst_161 = arith.constant 0.000000e+00 : f32
    %158 = vector.broadcast %cst_161 : f32 to vector<8x8x4xf32>
    %159 = arith.cmpf ogt, %157, %158 : vector<8x8x4xf32>
    %cst_162 = arith.constant 2.000000e-01 : f32
    %160 = vector.broadcast %cst_162 : f32 to vector<8x8x4xf32>
    %161 = arith.mulf %160, %157 : vector<8x8x4xf32>
    %162 = arith.select %159, %157, %161 : vector<8x8x4xi1>, vector<8x8x4xf32>
    %163 = vector.shape_cast %162 : vector<8x8x4xf32> to vector<64x4xf32>
    %c0_163 = arith.constant 0 : index
    %c0_164 = arith.constant 0 : index
    %164 = vector.load %arg5[%c0_163, %c0_164] : memref<64x128xf32, #tpu.memory_space<vmem>>, vector<64x128xf32>
    %c11 = arith.constant 11 : index
    %c0_165 = arith.constant 0 : index
    %c0_166 = arith.constant 0 : index
    %165 = vector.load %arg2[%c11, %c0_165, %c0_166] : memref<16x4x128xf32, #tpu.memory_space<vmem>>, vector<1x4x128xf32>
    %166 = vector.shape_cast %165 : vector<1x4x128xf32> to vector<4x128xf32>
    %cst_167 = arith.constant dense<0.000000e+00> : vector<64x128xf32>
    %167 = tpu.matmul %163, %166, %cst_167 {dimension_numbers = #tpu.dot_dimension_numbers<[1], [0], [0], [1], [0, 0, 1, 1], [], []>} : vector<64x4xf32>, vector<4x128xf32>, vector<64x128xf32> -> vector<64x128xf32>
    %168 = arith.addf %164, %167 : vector<64x128xf32>
    %c0_168 = arith.constant 0 : index
    %c0_169 = arith.constant 0 : index
    %169 = vector.load %arg5[%c0_168, %c0_169] : memref<64x128xf32, #tpu.memory_space<vmem>>, vector<64x128xf32>
    tpu.vector_store %arg5[%c0_168, %c0_169], %168 {strides = array<i32>} : memref<64x128xf32, #tpu.memory_space<vmem>>, vector<64x128xf32>,
    %c0_170 = arith.constant 0 : index
    %c2_171 = arith.constant 2 : index
    %c1_172 = arith.constant 1 : index
    %c0_173 = arith.constant 0 : index
    %c0_174 = arith.constant 0 : index
    %170 = vector.load %arg1[%c0_170, %c2_171, %c1_172, %c0_173, %c0_174] : memref<1x4x9x9x4xf32, #tpu.memory_space<vmem>>, vector<1x1x8x8x4xf32>
    %171 = vector.shape_cast %170 : vector<1x1x8x8x4xf32> to vector<8x8x4xf32>
    %cst_175 = arith.constant 0.000000e+00 : f32
    %172 = vector.broadcast %cst_175 : f32 to vector<8x8x4xf32>
    %173 = arith.cmpf ogt, %171, %172 : vector<8x8x4xf32>
    %cst_176 = arith.constant 2.000000e-01 : f32
    %174 = vector.broadcast %cst_176 : f32 to vector<8x8x4xf32>
    %175 = arith.mulf %174, %171 : vector<8x8x4xf32>
    %176 = arith.select %173, %171, %175 : vector<8x8x4xi1>, vector<8x8x4xf32>
    %177 = vector.shape_cast %176 : vector<8x8x4xf32> to vector<64x4xf32>
    %c0_177 = arith.constant 0 : index
    %c0_178 = arith.constant 0 : index
    %178 = vector.load %arg5[%c0_177, %c0_178] : memref<64x128xf32, #tpu.memory_space<vmem>>, vector<64x128xf32>
    %c12 = arith.constant 12 : index
    %c0_179 = arith.constant 0 : index
    %c0_180 = arith.constant 0 : index
    %179 = vector.load %arg2[%c12, %c0_179, %c0_180] : memref<16x4x128xf32, #tpu.memory_space<vmem>>, vector<1x4x128xf32>
    %180 = vector.shape_cast %179 : vector<1x4x128xf32> to vector<4x128xf32>
    %cst_181 = arith.constant dense<0.000000e+00> : vector<64x128xf32>
    %181 = tpu.matmul %177, %180, %cst_181 {dimension_numbers = #tpu.dot_dimension_numbers<[1], [0], [0], [1], [0, 0, 1, 1], [], []>} : vector<64x4xf32>, vector<4x128xf32>, vector<64x128xf32> -> vector<64x128xf32>
    %182 = arith.addf %178, %181 : vector<64x128xf32>
    %c0_182 = arith.constant 0 : index
    %c0_183 = arith.constant 0 : index
    %183 = vector.load %arg5[%c0_182, %c0_183] : memref<64x128xf32, #tpu.memory_space<vmem>>, vector<64x128xf32>
    tpu.vector_store %arg5[%c0_182, %c0_183], %182 {strides = array<i32>} : memref<64x128xf32, #tpu.memory_space<vmem>>, vector<64x128xf32>,
    %c0_184 = arith.constant 0 : index
    %c3_185 = arith.constant 3 : index
    %c1_186 = arith.constant 1 : index
    %c0_187 = arith.constant 0 : index
    %c0_188 = arith.constant 0 : index
    %184 = vector.load %arg1[%c0_184, %c3_185, %c1_186, %c0_187, %c0_188] : memref<1x4x9x9x4xf32, #tpu.memory_space<vmem>>, vector<1x1x8x8x4xf32>
    %185 = vector.shape_cast %184 : vector<1x1x8x8x4xf32> to vector<8x8x4xf32>
    %cst_189 = arith.constant 0.000000e+00 : f32
    %186 = vector.broadcast %cst_189 : f32 to vector<8x8x4xf32>
    %187 = arith.cmpf ogt, %185, %186 : vector<8x8x4xf32>
    %cst_190 = arith.constant 2.000000e-01 : f32
    %188 = vector.broadcast %cst_190 : f32 to vector<8x8x4xf32>
    %189 = arith.mulf %188, %185 : vector<8x8x4xf32>
    %190 = arith.select %187, %185, %189 : vector<8x8x4xi1>, vector<8x8x4xf32>
    %191 = vector.shape_cast %190 : vector<8x8x4xf32> to vector<64x4xf32>
    %c0_191 = arith.constant 0 : index
    %c0_192 = arith.constant 0 : index
    %192 = vector.load %arg5[%c0_191, %c0_192] : memref<64x128xf32, #tpu.memory_space<vmem>>, vector<64x128xf32>
    %c13 = arith.constant 13 : index
    %c0_193 = arith.constant 0 : index
    %c0_194 = arith.constant 0 : index
    %193 = vector.load %arg2[%c13, %c0_193, %c0_194] : memref<16x4x128xf32, #tpu.memory_space<vmem>>, vector<1x4x128xf32>
    %194 = vector.shape_cast %193 : vector<1x4x128xf32> to vector<4x128xf32>
    %cst_195 = arith.constant dense<0.000000e+00> : vector<64x128xf32>
    %195 = tpu.matmul %191, %194, %cst_195 {dimension_numbers = #tpu.dot_dimension_numbers<[1], [0], [0], [1], [0, 0, 1, 1], [], []>} : vector<64x4xf32>, vector<4x128xf32>, vector<64x128xf32> -> vector<64x128xf32>
    %196 = arith.addf %192, %195 : vector<64x128xf32>
    %c0_196 = arith.constant 0 : index
    %c0_197 = arith.constant 0 : index
    %197 = vector.load %arg5[%c0_196, %c0_197] : memref<64x128xf32, #tpu.memory_space<vmem>>, vector<64x128xf32>
    tpu.vector_store %arg5[%c0_196, %c0_197], %196 {strides = array<i32>} : memref<64x128xf32, #tpu.memory_space<vmem>>, vector<64x128xf32>,
    %c0_198 = arith.constant 0 : index
    %c2_199 = arith.constant 2 : index
    %c1_200 = arith.constant 1 : index
    %c1_201 = arith.constant 1 : index
    %c0_202 = arith.constant 0 : index
    %198 = vector.load %arg1[%c0_198, %c2_199, %c1_200, %c1_201, %c0_202] : memref<1x4x9x9x4xf32, #tpu.memory_space<vmem>>, vector<1x1x8x8x4xf32>
    %199 = vector.shape_cast %198 : vector<1x1x8x8x4xf32> to vector<8x8x4xf32>
    %cst_203 = arith.constant 0.000000e+00 : f32
    %200 = vector.broadcast %cst_203 : f32 to vector<8x8x4xf32>
    %201 = arith.cmpf ogt, %199, %200 : vector<8x8x4xf32>
    %cst_204 = arith.constant 2.000000e-01 : f32
    %202 = vector.broadcast %cst_204 : f32 to vector<8x8x4xf32>
    %203 = arith.mulf %202, %199 : vector<8x8x4xf32>
    %204 = arith.select %201, %199, %203 : vector<8x8x4xi1>, vector<8x8x4xf32>
    %205 = vector.shape_cast %204 : vector<8x8x4xf32> to vector<64x4xf32>
    %c0_205 = arith.constant 0 : index
    %c0_206 = arith.constant 0 : index
    %206 = vector.load %arg5[%c0_205, %c0_206] : memref<64x128xf32, #tpu.memory_space<vmem>>, vector<64x128xf32>
    %c14 = arith.constant 14 : index
    %c0_207 = arith.constant 0 : index
    %c0_208 = arith.constant 0 : index
    %207 = vector.load %arg2[%c14, %c0_207, %c0_208] : memref<16x4x128xf32, #tpu.memory_space<vmem>>, vector<1x4x128xf32>
    %208 = vector.shape_cast %207 : vector<1x4x128xf32> to vector<4x128xf32>
    %cst_209 = arith.constant dense<0.000000e+00> : vector<64x128xf32>
    %209 = tpu.matmul %205, %208, %cst_209 {dimension_numbers = #tpu.dot_dimension_numbers<[1], [0], [0], [1], [0, 0, 1, 1], [], []>} : vector<64x4xf32>, vector<4x128xf32>, vector<64x128xf32> -> vector<64x128xf32>
    %210 = arith.addf %206, %209 : vector<64x128xf32>
    %c0_210 = arith.constant 0 : index
    %c0_211 = arith.constant 0 : index
    %211 = vector.load %arg5[%c0_210, %c0_211] : memref<64x128xf32, #tpu.memory_space<vmem>>, vector<64x128xf32>
    tpu.vector_store %arg5[%c0_210, %c0_211], %210 {strides = array<i32>} : memref<64x128xf32, #tpu.memory_space<vmem>>, vector<64x128xf32>,
    %c0_212 = arith.constant 0 : index
    %c3_213 = arith.constant 3 : index
    %c1_214 = arith.constant 1 : index
    %c1_215 = arith.constant 1 : index
    %c0_216 = arith.constant 0 : index
    %212 = vector.load %arg1[%c0_212, %c3_213, %c1_214, %c1_215, %c0_216] : memref<1x4x9x9x4xf32, #tpu.memory_space<vmem>>, vector<1x1x8x8x4xf32>
    %213 = vector.shape_cast %212 : vector<1x1x8x8x4xf32> to vector<8x8x4xf32>
    %cst_217 = arith.constant 0.000000e+00 : f32
    %214 = vector.broadcast %cst_217 : f32 to vector<8x8x4xf32>
    %215 = arith.cmpf ogt, %213, %214 : vector<8x8x4xf32>
    %cst_218 = arith.constant 2.000000e-01 : f32
    %216 = vector.broadcast %cst_218 : f32 to vector<8x8x4xf32>
    %217 = arith.mulf %216, %213 : vector<8x8x4xf32>
    %218 = arith.select %215, %213, %217 : vector<8x8x4xi1>, vector<8x8x4xf32>
    %219 = vector.shape_cast %218 : vector<8x8x4xf32> to vector<64x4xf32>
    %c0_219 = arith.constant 0 : index
    %c0_220 = arith.constant 0 : index
    %220 = vector.load %arg5[%c0_219, %c0_220] : memref<64x128xf32, #tpu.memory_space<vmem>>, vector<64x128xf32>
    %c15 = arith.constant 15 : index
    %c0_221 = arith.constant 0 : index
    %c0_222 = arith.constant 0 : index
    %221 = vector.load %arg2[%c15, %c0_221, %c0_222] : memref<16x4x128xf32, #tpu.memory_space<vmem>>, vector<1x4x128xf32>
    %222 = vector.shape_cast %221 : vector<1x4x128xf32> to vector<4x128xf32>
    %cst_223 = arith.constant dense<0.000000e+00> : vector<64x128xf32>
    %223 = tpu.matmul %219, %222, %cst_223 {dimension_numbers = #tpu.dot_dimension_numbers<[1], [0], [0], [1], [0, 0, 1, 1], [], []>} : vector<64x4xf32>, vector<4x128xf32>, vector<64x128xf32> -> vector<64x128xf32>
    %224 = arith.addf %220, %223 : vector<64x128xf32>
    %c0_224 = arith.constant 0 : index
    %c0_225 = arith.constant 0 : index
    %225 = vector.load %arg5[%c0_224, %c0_225] : memref<64x128xf32, #tpu.memory_space<vmem>>, vector<64x128xf32>
    tpu.vector_store %arg5[%c0_224, %c0_225], %224 {strides = array<i32>} : memref<64x128xf32, #tpu.memory_space<vmem>>, vector<64x128xf32>,
    %c0_226 = arith.constant 0 : index
    %c0_227 = arith.constant 0 : index
    %226 = vector.load %arg5[%c0_226, %c0_227] : memref<64x128xf32, #tpu.memory_space<vmem>>, vector<64x128xf32>
    %c0_228 = arith.constant 0 : index
    %c0_229 = arith.constant 0 : index
    %c0_230 = arith.constant 0 : index
    %227 = vector.load %arg3[%c0_228, %c0_229, %c0_230] : memref<1x64x128xf32, #tpu.memory_space<vmem>>, vector<1x64x128xf32>
    %228 = vector.shape_cast %227 : vector<1x64x128xf32> to vector<64x128xf32>
    %229 = vector.shape_cast %226 : vector<64x128xf32> to vector<1x64x128xf32>
    tpu.vector_store %arg3[%c0_228, %c0_229, %c0_230], %229 {strides = array<i32>} : memref<1x64x128xf32, #tpu.memory_space<vmem>>, vector<1x64x128xf32>,
    %cst_231 = arith.constant dense<0.000000e+00> : vector<128xf32>
    %230 = vector.multi_reduction <add>, %226, %cst_231 [0] : vector<64x128xf32> to vector<128xf32>
    %231 = vector.shape_cast %230 : vector<128xf32> to vector<1x128xf32>
    %cst_232 = arith.constant 1.562500e-02 : f32
    %232 = vector.broadcast %cst_232 : f32 to vector<1x128xf32>
    %233 = arith.mulf %231, %232 : vector<1x128xf32>
    %234 = vector.broadcast %233 : vector<1x128xf32> to vector<64x128xf32>
    %235 = arith.subf %226, %234 : vector<64x128xf32>
    %236 = arith.mulf %235, %235 : vector<64x128xf32>
    %cst_233 = arith.constant dense<0.000000e+00> : vector<128xf32>
    %237 = vector.multi_reduction <add>, %236, %cst_233 [0] : vector<64x128xf32> to vector<128xf32>
    %238 = vector.shape_cast %237 : vector<128xf32> to vector<1x128xf32>
    %239 = tpu.concatenate %231, %238 in 0 : vector<1x128xf32>, vector<1x128xf32> -> vector<2x128xf32>
    %c0_234 = arith.constant 0 : index
    %c0_235 = arith.constant 0 : index
    %c0_236 = arith.constant 0 : index
    %240 = vector.load %arg4[%c0_234, %c0_235, %c0_236] : memref<1x2x128xf32, #tpu.memory_space<vmem>>, vector<1x2x128xf32>
    %241 = vector.shape_cast %240 : vector<1x2x128xf32> to vector<2x128xf32>
    %242 = vector.shape_cast %239 : vector<2x128xf32> to vector<1x2x128xf32>
    tpu.vector_store %arg4[%c0_234, %c0_235, %c0_236], %242 {strides = array<i32>} : memref<1x2x128xf32, #tpu.memory_space<vmem>>, vector<1x2x128xf32>,
    return
  }
  func.func @transform_0(%arg0: i32) -> (i32, i32, i32, i32, i32) {
    %c0_i32 = arith.constant 0 : i32
    %c0_i32_0 = arith.constant 0 : i32
    %c0_i32_1 = arith.constant 0 : i32
    %c0_i32_2 = arith.constant 0 : i32
    %c0_i32_3 = arith.constant 0 : i32
    return %arg0, %c0_i32, %c0_i32_0, %c0_i32_1, %c0_i32_2 : i32, i32, i32, i32, i32
  }
  func.func @transform_1(%arg0: i32) -> (i32, i32, i32) {
    %c0_i32 = arith.constant 0 : i32
    %c0_i32_0 = arith.constant 0 : i32
    %c0_i32_1 = arith.constant 0 : i32
    %c0_i32_2 = arith.constant 0 : i32
    return %c0_i32, %c0_i32_0, %c0_i32_1 : i32, i32, i32
  }
  func.func @transform_2(%arg0: i32) -> (i32, i32, i32) {
    %c0_i32 = arith.constant 0 : i32
    %c0_i32_0 = arith.constant 0 : i32
    %c0_i32_1 = arith.constant 0 : i32
    return %arg0, %c0_i32, %c0_i32_0 : i32, i32, i32
  }
  func.func @transform_3(%arg0: i32) -> (i32, i32, i32) {
    %c0_i32 = arith.constant 0 : i32
    %c0_i32_0 = arith.constant 0 : i32
    %c0_i32_1 = arith.constant 0 : i32
    return %arg0, %c0_i32, %c0_i32_0 : i32, i32, i32
  }
}

</mosaic_0001>

<bundles_post_ra>
// kernel: downsample_forward.1
= control target key start
LH: loop header
LB: loop body
LE: loop exit
PB: predicated region body
PF: predicated region fallthrough
CT: control target
= control target key end

     0   :  { %s4194_s12 = smov 0   ;;  %s4511_s0 = inlined_call_operand.vmem [shape: f32[2,4,9,9,4], index: 0, kind: input, shape index: {}]   ;;  %s4512_s1 = inlined_call_operand.vmem [shape: f32[16,4,128], index: 1, kind: input, shape index: {}]   ;;  %s4513_s2 = inlined_call_operand.vmem [shape: f32[2,64,128], index: 2, kind: output, shape index: {0}]   ;;  %s4514_s3 = inlined_call_operand.vmem [shape: f32[2,2,128], index: 3, kind: output, shape index: {1}]  }
   0x1 LB: > { %s3386_s13 = sadd.s32 4294967295, %s4172_s12   ;;  %p3390_p0 = scmp.ge.s32.totalorder %s4172_s12, 1  ;;  %s4172_s12 = sphi %s4194_s12, %s14_s12  }
   0x2   : > { %p140_p1 = scmp.lt.s32.totalorder %s4172_s12, 3 }
   0x4   : > { %p141_p2 = pnand %p3390_p0, %p140_p1 }
   0x5   : > { %v230_v0 = vld [vmem:[%s4512_s1] sm:$0xf] (!%p141_p2)  ;;  %vm256_vm0 = vcmask (!%p141_p2), 1043456   ;;  %p168_p3 = scmp.lt.s32.totalorder (!%p141_p2), %s3386_s13, 1  ;;  %v3412_v2 = vld [vmem:[%s4512_s1 + $0x4] sm:$0xf] (!%p141_p2) }
   0x6   : > { %144 = sbr.rel (%p141_p2) target bundleno = 412 (0x19c), region = 28  ;;  %v3530_v1 = vld [vmem:[%s4512_s1 + $0x20] sm:$0xf] (!%p141_p2)  ;;  %3813 = vmatprep.subr.msk.mxu1 (!%p141_p2), %vm256_vm0, %v230_v0  ;;  %v3548_v3 = vld [vmem:[%s4512_s1 + $0x24] sm:$0xf] (!%p141_p2)  ;;  %vm231_vm1 = vcmask (!%p141_p2), 31744  }
   0x7   : > { %3925 = vmatprep.subr.msk.mxu0 (!%p141_p2), %vm256_vm0, %v3530_v1  ;;  %3814 = vmatpush3.msk.msra.mxu1 (!%p141_p2), %vm256_vm0, %v230_v0  ;;  %v3422_v22 = vld [vmem:[%s4512_s1 + $0x8] sm:$0xf] (!%p141_p2)  ;;  %v3440_v51 = vld [vmem:[%s4512_s1 + $0xc] sm:$0xf] (!%p141_p2) }
   0x8   : > { %3926 = vmatpush3.msk.msra.mxu0 (!%p141_p2), %vm256_vm0, %v3530_v1  ;;  %3827 = vmatprep.subr.msk.mxu1 (!%p141_p2), %vm256_vm0, %v3412_v2  ;;  %v3566_v23 = vld [vmem:[%s4512_s1 + $0x28] sm:$0xf] (!%p141_p2)  ;;  %v3584_v52 = vld [vmem:[%s4512_s1 + $0x2c] sm:$0xf] (!%p141_p2) }
   0x9   : > { %3939 = vmatprep.subr.msk.mxu0 (!%p141_p2), %vm256_vm0, %v3548_v3 }
   0xd   : > { %s4516_s13 = smov (!%p168_p3, %s3386_s13), 1 }
   0xe   : > { %s4157_s22 = smul.u32 576, %s4516_s13  ;;  %s3394_s29 = sshll.u32 %s4516_s13, 1 }
   0xf   : > { %s181_s5 = scalar_lea.vmem %s4514_s3, %s3394_s29 }
  0x10   : > { %s4226_s25 = scalar_lea.vmem %s4511_s0, %s4157_s22 }
  0x11   : > { %v190_v4 = vld [vmem:[%s4226_s25] sm:$0xff]  ;;  %v3522_v5 = vld [vmem:[%s4226_s25 + $0x10] sm:$0xff] }
  0x12   : > { %v3523_v6 = vld [vmem:[%s4226_s25 + $0x20] sm:$0xff]  ;;  %vm198_vm2 = vcmp.gt.f32.partialorder %v190_v4, 0.0  ;;  %v206_v7 = vmul.f32 0.2, %v190_v4  ;;  %vm1723_vm3 = vcmp.gt.f32.partialorder %v3522_v5, 0.0  ;;  %v3524_v10 = vld [vmem:[%s4226_s25 + $0x30] sm:$0xff] }
  0x13   : > { %v1731_v8 = vmul.f32 0.2, %v3522_v5  ;;  %vm1724_vm4 = vcmp.gt.f32.partialorder %v3523_v6, 0.0  ;;  %v1732_v9 = vmul.f32 0.2, %v3523_v6  ;;  %v3525_v11 = vld [vmem:[%s4226_s25 + $0x40] sm:$0xff] }
  0x14   : > { %v3526_v12 = vld [vmem:[%s4226_s25 + $0x50] sm:$0xff]  ;;  %v214_v13 = vsel %vm198_vm2, %v190_v4, %v206_v7  ;;  %vm1725_vm5 = vcmp.gt.f32.partialorder %v3524_v10, 0.0  ;;  %v1733_v15 = vmul.f32 0.2, %v3524_v10  ;;  %v3527_v16 = vld [vmem:[%s4226_s25 + $0x60] sm:$0xff]  ;;  %vm1726_vm6 = vcmp.gt.f32.partialorder %v3525_v11, 0.0 }
  0x15   : > { %v1739_v14 = vsel %vm1723_vm3, %v3522_v5, %v1731_v8  ;;  %3815 = vmatprep.mubr.msk.f32.mxu1 %vm231_vm1, %v214_v13  ;;  %v1740_v17 = vsel %vm1724_vm4, %v3523_v6, %v1732_v9  ;;  %v1734_v18 = vmul.f32 0.2, %v3525_v11  ;;  %vm1727_vm7 = vcmp.gt.f32.partialorder %v3526_v12, 0.0  ;;  %v3528_v19 = vld [vmem:[%s4226_s25 + $0x70] sm:$0xff]  ;;  %v3529_v28 = vld [vmem:[%s4226_s25 + $0x80] sm:$0xff] }
  0x16   : > { %3927 = vmatprep.mubr.msk.f32.mxu0 %vm231_vm1, %v1739_v14  ;;  %3816 = vmatmul.mubr.msk.f32.vlgmr.msra.gmra.mrb[0].mxu1 %vm231_vm1, %v1739_v14  ;;  %v1741_v20 = vsel %vm1725_vm5, %v3524_v10, %v1733_v15  ;;  %v1735_v21 = vmul.f32 0.2, %v3526_v12  ;;  %v1736_v25 = vmul.f32 0.2, %v3527_v16  ;;  %vm1728_vm8 = vcmp.gt.f32.partialorder %v3527_v16, 0.0  ;;  %v3404_v29 = vld [vmem:[%s4226_s25 + $0x90] sm:$0xff] }
  0x17   : > { %3928 = vmatmul.mubr.msk.f32.vlgmr.msra.gmra.mrb[0].mxu0 %vm231_vm1, %v1740_v17  ;;  %3828 = vmatpush3.msk.msra.mxu1 %vm256_vm0, %v3412_v2  ;;  %v1742_v24 = vsel %vm1726_vm6, %v3525_v11, %v1734_v18  ;;  %v1737_v27 = vmul.f32 0.2, %v3528_v19  ;;  %vm1729_vm9 = vcmp.gt.f32.partialorder %v3528_v19, 0.0  ;;  %v3540_v30 = vld [vmem:[%s4226_s25 + $0xa0] sm:$0xff]  ;;  %v1738_v32 = vmul.f32 0.2, %v3529_v28 }
  0x18   : > { %3940 = vmatpush3.msk.msra.mxu0 %vm256_vm0, %v3548_v3  ;;  %3818 = vmatprep.mubr.msk.f32.mxu1 %vm231_vm1, %v1740_v17  ;;  %v1743_v26 = vsel %vm1727_vm7, %v3526_v12, %v1735_v21  ;;  %v1744_v31 = vsel %vm1728_vm8, %v3527_v16, %v1736_v25  ;;  %vm1730_vm10 = vcmp.gt.f32.partialorder %v3529_v28, 0.0  ;;  %v398_v34 = vmul.f32 0.2, %v3404_v29  ;;  %v3541_v36 = vld [vmem:[%s4226_s25 + $0xb0] sm:$0xff]  ;;  %v3542_v37 = vld [vmem:[%s4226_s25 + $0xc0] sm:$0xff] }
  0x19   : > { %3930 = vmatprep.mubr.msk.f32.mxu0 %vm231_vm1, %v1741_v20  ;;  %3841 = vmatprep.subr.msk.mxu1 %vm256_vm0, %v3422_v22  ;;  %v1745_v33 = vsel %vm1729_vm9, %v3528_v19, %v1737_v27  ;;  %v1922_v35 = vmul.f32 0.2, %v3540_v30  ;;  %vm390_vm11 = vcmp.gt.f32.partialorder %v3404_v29, 0.0  ;;  %vm1914_vm12 = vcmp.gt.f32.partialorder %v3540_v30, 0.0  ;;  %v3543_v42 = vld [vmem:[%s4226_s25 + $0xd0] sm:$0xff]  ;;  %v3544_v44 = vld [vmem:[%s4226_s25 + $0xe0] sm:$0xff] }
  0x1a   : > { %3953 = vmatprep.subr.msk.mxu0 %vm256_vm0, %v3566_v23  ;;  %3819 = vmatmul.mubr.msk.f32.gmra.mrb[2].mxu1 %vm231_vm1, %v1741_v20  ;;  %v1746_v38 = vsel %vm1730_vm10, %v3529_v28, %v1738_v32  ;;  %v1923_v39 = vmul.f32 0.2, %v3541_v36  ;;  %v406_v40 = vsel %vm390_vm11, %v3404_v29, %v398_v34  ;;  %vm1915_vm13 = vcmp.gt.f32.partialorder %v3541_v36, 0.0  ;;  %v3545_v48 = vld [vmem:[%s4226_s25 + $0xf0] sm:$0xff]  ;;  %v3546_v50 = vld [vmem:[%s4226_s25 + $0x100] sm:$0xff] }
  0x1b   : > { %3931 = vmatmul.mubr.msk.f32.gmra.mrb[2].mxu0 %vm231_vm1, %v1742_v24  ;;  %3821 = vmatprep.mubr.msk.f32.mxu1 %vm231_vm1, %v1742_v24  ;;  %v1930_v41 = vsel %vm1914_vm12, %v3540_v30, %v1922_v35  ;;  %v1924_v43 = vmul.f32 0.2, %v3542_v37  ;;  %vm1916_vm14 = vcmp.gt.f32.partialorder %v3542_v37, 0.0  ;;  %v1925_v46 = vmul.f32 0.2, %v3543_v42  ;;  %v3547_v57 = vld [vmem:[%s4226_s25 + $0x110] sm:$0xff] }
  0x1c   : > { %3933 = vmatprep.mubr.msk.f32.mxu0 %vm231_vm1, %v1743_v26  ;;  %v1931_v45 = vsel %vm1915_vm13, %v3541_v36, %v1923_v39  ;;  %vm1917_vm15 = vcmp.gt.f32.partialorder %v3543_v42, 0.0  ;;  %v1926_v47 = vmul.f32 0.2, %v3544_v44  ;;  %vm1918_vm2 = vcmp.gt.f32.partialorder %v3544_v44, 0.0  ;;  %v572_v58 = vld [vmem:[%s4226_s25 + $0x1] sm:$0xff]  ;;  %v3558_v59 = vld [vmem:[%s4226_s25 + $0x11] sm:$0xff] }
  0x1d   : > { %v1932_v49 = vsel %vm1916_vm14, %v3542_v37, %v1924_v43  ;;  %v1933_v53 = vsel %vm1917_vm15, %v3543_v42, %v1925_v46  ;;  %v1927_v54 = vmul.f32 0.2, %v3545_v48  ;;  %vm1919_vm3 = vcmp.gt.f32.partialorder %v3545_v48, 0.0  ;;  %v3559_v1 = vld [vmem:[%s4226_s25 + $0x21] sm:$0xff]  ;;  %v3560_v2 = vld [vmem:[%s4226_s25 + $0x31] sm:$0xff] }
  0x1e   : > { %3822 = vmatmul.mubr.msk.f32.gmra.mrb[4].mxu1 %vm231_vm1, %v1743_v26  ;;  %v1934_v55 = vsel %vm1918_vm2, %v3544_v44, %v1926_v47  ;;  %v1928_v56 = vmul.f32 0.2, %v3546_v50  ;;  %vm1920_vm4 = vcmp.gt.f32.partialorder %v3546_v50, 0.0  ;;  %v1929_v61 = vmul.f32 0.2, %v3547_v57  ;;  %v3561_v7 = vld [vmem:[%s4226_s25 + $0x41] sm:$0xff] }
  0x1f   : > { %3934 = vmatmul.mubr.msk.f32.gmra.mrb[4].mxu0 %vm231_vm1, %v1744_v31  ;;  %3824 = vmatprep.mubr.msk.f32.mxu1 %vm231_vm1, %v1744_v31  ;;  %v1935_v60 = vsel %vm1919_vm3, %v3545_v48, %v1927_v54  ;;  %vm1921_vm5 = vcmp.gt.f32.partialorder %v3547_v57, 0.0  ;;  %v588_v63 = vmul.f32 0.2, %v572_v58  ;;  %v2112_v0 = vmul.f32 0.2, %v3558_v59  ;;  %v3562_v9 = vld [vmem:[%s4226_s25 + $0x51] sm:$0xff] }
  0x20   : > { %3936 = vmatprep.mubr.msk.f32.mxu0 %vm231_vm1, %v1745_v33  ;;  %v1936_v62 = vsel %vm1920_vm4, %v3546_v50, %v1928_v56  ;;  %vm580_vm6 = vcmp.gt.f32.partialorder %v572_v58, 0.0  ;;  %vm2104_vm7 = vcmp.gt.f32.partialorder %v3558_v59, 0.0  ;;  %v1937_v3 = vsel %vm1921_vm5, %v3547_v57, %v1929_v61  ;;  %v3563_v13 = vld [vmem:[%s4226_s25 + $0x61] sm:$0xff]  ;;  %v3564_v15 = vld [vmem:[%s4226_s25 + $0x71] sm:$0xff] }
  0x21   : > { %v2113_v4 = vmul.f32 0.2, %v3559_v1  ;;  %v596_v5 = vsel %vm580_vm6, %v572_v58, %v588_v63  ;;  %v2120_v6 = vsel %vm2104_vm7, %v3558_v59, %v2112_v0  ;;  %vm2105_vm8 = vcmp.gt.f32.partialorder %v3559_v1, 0.0  ;;  %v3458_v16 = vld [vmem:[%s4512_s1 + $0x10] sm:$0xf]  ;;  %v3576_v24 = vld [vmem:[%s4226_s25 + $0xa1] sm:$0xff] }
  0x22   : > { %3825 = vmatmul.mubr.msk.f32.gmra.mrb[6].mxu1 %vm231_vm1, %v1745_v33  ;;  %v2114_v8 = vmul.f32 0.2, %v3560_v2  ;;  %vm2106_vm9 = vcmp.gt.f32.partialorder %v3560_v2, 0.0  ;;  %v2115_v11 = vmul.f32 0.2, %v3561_v7  ;;  %vm2107_vm10 = vcmp.gt.f32.partialorder %v3561_v7, 0.0 }
  0x23   : > { %3937 = vmatmul.mubr.msk.f32.gmra.mrb[6].mxu0 %vm231_vm1, %v1746_v38  ;;  %3829 = vmatprep.mubr.msk.f32.mxu1 %vm231_vm1, %v406_v40  ;;  %v2121_v10 = vsel %vm2105_vm8, %v3559_v1, %v2113_v4  ;;  %v2116_v12 = vmul.f32 0.2, %v3562_v9  ;;  %vm2108_vm11 = vcmp.gt.f32.partialorder %v3562_v9, 0.0  ;;  %v3602_v17 = vld [vmem:[%s4512_s1 + $0x30] sm:$0xf]  ;;  %vm2109_vm12 = vcmp.gt.f32.partialorder %v3563_v13, 0.0 }
  0x24   : > { %3941 = vmatprep.mubr.msk.f32.mxu0 %vm231_vm1, %v1930_v41  ;;  %v2122_v14 = vsel %vm2106_vm9, %v3560_v2, %v2114_v8  ;;  %v2123_v18 = vsel %vm2107_vm10, %v3561_v7, %v2115_v11  ;;  %v2117_v19 = vmul.f32 0.2, %v3563_v13  ;;  %v2118_v21 = vmul.f32 0.2, %v3564_v15  ;;  %v3577_v30 = vld [vmem:[%s4226_s25 + $0xb1] sm:$0xff]  ;;  %v3578_v31 = vld [vmem:[%s4226_s25 + $0xc1] sm:$0xff] }
  0x25   : > { %v2124_v20 = vsel %vm2108_vm11, %v3562_v9, %v2116_v12  ;;  %vm2110_vm13 = vcmp.gt.f32.partialorder %v3564_v15, 0.0  ;;  %v2302_v29 = vmul.f32 0.2, %v3576_v24  ;;  %vm2294_vm2 = vcmp.gt.f32.partialorder %v3576_v24, 0.0  ;;  %v3579_v36 = vld [vmem:[%s4226_s25 + $0xd1] sm:$0xff]  ;;  %v3580_v38 = vld [vmem:[%s4226_s25 + $0xe1] sm:$0xff] }
  0x26   : > { %3830 = vmatmul.mubr.msk.f32.vlgmr.msra.gmra.mrb[0].mxu1 %vm231_vm1, %v1930_v41  ;;  %v2125_v25 = vsel %vm2109_vm12, %v3563_v13, %v2117_v19  ;;  %v2126_v27 = vsel %vm2110_vm13, %v3564_v15, %v2118_v21  ;;  %v2303_v33 = vmul.f32 0.2, %v3577_v30  ;;  %vm2295_vm3 = vcmp.gt.f32.partialorder %v3577_v30, 0.0  ;;  %v3581_v42 = vld [vmem:[%s4226_s25 + $0xf1] sm:$0xff]  ;;  %v3582_v44 = vld [vmem:[%s4226_s25 + $0x101] sm:$0xff] }
  0x27   : > { %3942 = vmatmul.mubr.msk.f32.vlgmr.msra.gmra.mrb[0].mxu0 %vm231_vm1, %v1931_v45  ;;  %3842 = vmatpush3.msk.msra.mxu1 %vm256_vm0, %v3422_v22  ;;  %v3565_v22 = vld [vmem:[%s4226_s25 + $0x81] sm:$0xff]  ;;  %v2310_v35 = vsel %vm2294_vm2, %v3576_v24, %v2302_v29  ;;  %v2304_v37 = vmul.f32 0.2, %v3578_v31  ;;  %vm2296_vm4 = vcmp.gt.f32.partialorder %v3578_v31, 0.0  ;;  %v2305_v40 = vmul.f32 0.2, %v3579_v36 }
  0x28   : > { %3954 = vmatpush3.msk.msra.mxu0 %vm256_vm0, %v3566_v23  ;;  %3832 = vmatprep.mubr.msk.f32.mxu1 %vm231_vm1, %v1931_v45  ;;  %v3432_v23 = vld [vmem:[%s4226_s25 + $0x91] sm:$0xff]  ;;  %v2119_v26 = vmul.f32 0.2, %v3565_v22  ;;  %vm2111_vm14 = vcmp.gt.f32.partialorder %v3565_v22, 0.0  ;;  %v2311_v39 = vsel %vm2295_vm3, %v3577_v30, %v2303_v33  ;;  %vm2297_vm5 = vcmp.gt.f32.partialorder %v3579_v36, 0.0  ;;  %v3595_v59 = vld [vmem:[%s4226_s25 + $0x140] sm:$0xff] }
  0x29   : > { %3944 = vmatprep.mubr.msk.f32.mxu0 %vm231_vm1, %v1932_v49  ;;  %3855 = vmatprep.subr.msk.mxu1 %vm256_vm0, %v3440_v51  ;;  %v778_v28 = vmul.f32 0.2, %v3432_v23  ;;  %vm770_vm15 = vcmp.gt.f32.partialorder %v3432_v23, 0.0  ;;  %v2306_v41 = vmul.f32 0.2, %v3580_v38  ;;  %v2312_v43 = vsel %vm2296_vm4, %v3578_v31, %v2304_v37  ;;  %v3597_v1 = vld [vmem:[%s4226_s25 + $0x160] sm:$0xff] }
  0x2a   : > { %3967 = vmatprep.subr.msk.mxu0 %vm256_vm0, %v3584_v52  ;;  %3833 = vmatmul.mubr.msk.f32.gmra.mrb[2].mxu1 %vm231_vm1, %v1932_v49  ;;  %v2127_v32 = vsel %vm2111_vm14, %v3565_v22, %v2119_v26  ;;  %vm2298_vm6 = vcmp.gt.f32.partialorder %v3580_v38, 0.0  ;;  %v3476_v45 = vld [vmem:[%s4512_s1 + $0x14] sm:$0xf]  ;;  %v2313_v47 = vsel %vm2297_vm5, %v3579_v36, %v2305_v40  ;;  %v2307_v48 = vmul.f32 0.2, %v3581_v42  ;;  %v3599_v7 = vld [vmem:[%s4226_s25 + $0x180] sm:$0xff] }
  0x2b   : > { %3945 = vmatmul.mubr.msk.f32.gmra.mrb[2].mxu0 %vm231_vm1, %v1933_v53  ;;  %3835 = vmatprep.mubr.msk.f32.mxu1 %vm231_vm1, %v1933_v53  ;;  %v786_v34 = vsel %vm770_vm15, %v3432_v23, %v778_v28  ;;  %v3620_v46 = vld [vmem:[%s4512_s1 + $0x34] sm:$0xf]  ;;  %v2314_v49 = vsel %vm2298_vm6, %v3580_v38, %v2306_v41  ;;  %vm2299_vm7 = vcmp.gt.f32.partialorder %v3581_v42, 0.0  ;;  %v2308_v50 = vmul.f32 0.2, %v3582_v44  ;;  %v3618_v38 = vld [vmem:[%s4226_s25 + $0x220] sm:$0xff] }
  0x2c   : > { %3947 = vmatprep.mubr.msk.f32.mxu0 %vm231_vm1, %v1934_v55  ;;  %vm2300_vm8 = vcmp.gt.f32.partialorder %v3582_v44, 0.0  ;;  %v3594_v53 = vld [vmem:[%s4226_s25 + $0x130] sm:$0xff]  ;;  %v2315_v54 = vsel %vm2299_vm7, %v3581_v42, %v2307_v48  ;;  %vm2486_vm12 = vcmp.gt.f32.partialorder %v3595_v59, 0.0  ;;  %vm2488_vm14 = vcmp.gt.f32.partialorder %v3597_v1, 0.0  ;;  %v3638_v11 = vld [vmem:[%s4512_s1 + $0x38] sm:$0xf] }
  0x2d   : > { %v2316_v56 = vsel %vm2300_vm8, %v3582_v44, %v2308_v50  ;;  %v2493_v58 = vmul.f32 0.2, %v3594_v53  ;;  %vm2485_vm11 = vcmp.gt.f32.partialorder %v3594_v53, 0.0  ;;  %v3600_v9 = vld [vmem:[%s4226_s25 + $0x190] sm:$0xff]  ;;  %v2498_v13 = vmul.f32 0.2, %v3599_v7 }
  0x2e   : > { %3836 = vmatmul.mubr.msk.f32.gmra.mrb[4].mxu1 %vm231_vm1, %v1934_v55  ;;  %vm2490_vm2 = vcmp.gt.f32.partialorder %v3599_v7, 0.0  ;;  %v2499_v15 = vmul.f32 0.2, %v3600_v9  ;;  %vm2491_vm3 = vcmp.gt.f32.partialorder %v3600_v9, 0.0  ;;  %v3613_v24 = vld [vmem:[%s4226_s25 + $0x1d0] sm:$0xff] }
  0x2f   : > { %3948 = vmatmul.mubr.msk.f32.gmra.mrb[4].mxu0 %vm231_vm1, %v1935_v60  ;;  %3838 = vmatprep.mubr.msk.f32.mxu1 %vm231_vm1, %v1935_v60  ;;  %v3596_v60 = vld [vmem:[%s4226_s25 + $0x150] sm:$0xff]  ;;  %v2501_v0 = vsel %vm2485_vm11, %v3594_v53, %v2493_v58  ;;  %v2506_v19 = vsel %vm2490_vm2, %v3599_v7, %v2498_v13  ;;  %vm2677_vm7 = vcmp.gt.f32.partialorder %v3613_v24, 0.0  ;;  %v3656_v40 = vld [vmem:[%s4512_s1 + $0x3c] sm:$0xf]  ;;  %v2690_v44 = vmul.f32 0.2, %v3618_v38 }
  0x30   : > { %3950 = vmatprep.mubr.msk.f32.mxu0 %vm231_vm1, %v1936_v62  ;;  %v2495_v2 = vmul.f32 0.2, %v3596_v60  ;;  %vm2487_vm13 = vcmp.gt.f32.partialorder %v3596_v60, 0.0  ;;  %v2507_v21 = vsel %vm2491_vm3, %v3600_v9, %v2499_v15  ;;  %v3615_v30 = vld [vmem:[%s4226_s25 + $0x1f0] sm:$0xff]  ;;  %v3631_v53 = vld [vmem:[%s4226_s25 + $0x141] sm:$0xff] }
  0x31   : > { %v3617_v36 = vld [vmem:[%s4226_s25 + $0x210] sm:$0xff]  ;;  %vm2867_vm2 = vcmp.gt.f32.partialorder %v3631_v53, 0.0 }
  0x32   : > { %3839 = vmatmul.mubr.msk.f32.gmra.mrb[6].mxu1 %vm231_vm1, %v1936_v62  ;;  %v2494_v62 = vmul.f32 0.2, %v3595_v59  ;;  %v2503_v8 = vsel %vm2487_vm13, %v3596_v60, %v2495_v2  ;;  %v2689_v42 = vmul.f32 0.2, %v3617_v36  ;;  %vm2681_vm11 = vcmp.gt.f32.partialorder %v3617_v36, 0.0  ;;  %v3504_v9 = vld [vmem:[%s4226_s25 + $0x1b1] sm:$0xff] }
  0x33   : > { %3951 = vmatmul.mubr.msk.f32.gmra.mrb[6].mxu0 %vm231_vm1, %v1937_v3  ;;  %3843 = vmatprep.mubr.msk.f32.mxu1 %vm231_vm1, %v596_v5  ;;  %v3598_v3 = vld [vmem:[%s4226_s25 + $0x170] sm:$0xff]  ;;  %v2496_v5 = vmul.f32 0.2, %v3597_v1 }
  0x34   : > { %3955 = vmatprep.mubr.msk.f32.mxu0 %vm231_vm1, %v2120_v6  ;;  %v2502_v4 = vsel %vm2486_vm12, %v3595_v59, %v2494_v62  ;;  %vm2489_vm15 = vcmp.gt.f32.partialorder %v3598_v3, 0.0  ;;  %vm2682_vm12 = vcmp.gt.f32.partialorder %v3618_v38, 0.0  ;;  %v2697_v48 = vsel %vm2681_vm11, %v3617_v36, %v2689_v42  ;;  %v3633_v59 = vld [vmem:[%s4226_s25 + $0x161] sm:$0xff] }
  0x35   : > { %v2504_v12 = vsel %vm2488_vm14, %v3597_v1, %v2496_v5  ;;  %v2698_v50 = vsel %vm2682_vm12, %v3618_v38, %v2690_v44  ;;  %v3635_v1 = vld [vmem:[%s4226_s25 + $0x181] sm:$0xff] }
  0x36   : > { %3844 = vmatmul.mubr.msk.f32.vlgmr.msra.gmra.mrb[0].mxu1 %vm231_vm1, %v2120_v6  ;;  %v2497_v6 = vmul.f32 0.2, %v3598_v3  ;;  %v2879_v5 = vmul.f32 0.2, %v3635_v1 }
  0x37   : > { %3956 = vmatmul.mubr.msk.f32.vlgmr.msra.gmra.mrb[0].mxu0 %vm231_vm1, %v2121_v10  ;;  %3856 = vmatpush3.msk.msra.mxu1 %vm256_vm0, %v3440_v51  ;;  %v3583_v51 = vld [vmem:[%s4226_s25 + $0x111] sm:$0xff] }
  0x38   : > { %3968 = vmatpush3.msk.msra.mxu0 %vm256_vm0, %v3584_v52  ;;  %3846 = vmatprep.mubr.msk.f32.mxu1 %vm231_vm1, %v2121_v10  ;;  %v3450_v52 = vld [vmem:[%s4226_s25 + $0x120] sm:$0xff]  ;;  %v2309_v55 = vmul.f32 0.2, %v3583_v51  ;;  %vm2301_vm9 = vcmp.gt.f32.partialorder %v3583_v51, 0.0  ;;  %v3494_v10 = vld [vmem:[%s4512_s1 + $0x18] sm:$0xf] }
  0x39   : > { %3958 = vmatprep.mubr.msk.f32.mxu0 %vm231_vm1, %v2122_v14  ;;  %3869 = vmatprep.subr.msk.mxu1 %vm256_vm0, %v3458_v16  ;;  %v969_v57 = vmul.f32 0.2, %v3450_v52  ;;  %vm961_vm10 = vcmp.gt.f32.partialorder %v3450_v52, 0.0 }
  0x3a   : > { %3981 = vmatprep.subr.msk.mxu0 %vm256_vm0, %v3602_v17  ;;  %3847 = vmatmul.mubr.msk.f32.gmra.mrb[2].mxu1 %vm231_vm1, %v2122_v14  ;;  %v2317_v61 = vsel %vm2301_vm9, %v3583_v51, %v2309_v55  ;;  %v2505_v14 = vsel %vm2489_vm15, %v3598_v3, %v2497_v6  ;;  %vm2679_vm9 = vcmp.gt.f32.partialorder %v3615_v30, 0.0  ;;  %v3636_v3 = vld [vmem:[%s4226_s25 + $0x191] sm:$0xff] }
  0x3b   : > { %3959 = vmatmul.mubr.msk.f32.gmra.mrb[2].mxu0 %vm231_vm1, %v2123_v18  ;;  %3849 = vmatprep.mubr.msk.f32.mxu1 %vm231_vm1, %v2123_v18  ;;  %v977_v63 = vsel %vm961_vm10, %v3450_v52, %v969_v57  ;;  %v3612_v18 = vld [vmem:[%s4226_s25 + $0x1c0] sm:$0xff]  ;;  %v2880_v7 = vmul.f32 0.2, %v3636_v3 }
  0x3c   : > { %3961 = vmatprep.mubr.msk.f32.mxu0 %vm231_vm1, %v2124_v20  ;;  %v2684_v23 = vmul.f32 0.2, %v3612_v18  ;;  %vm2676_vm6 = vcmp.gt.f32.partialorder %v3612_v18, 0.0 }
  0x3e   : > { %3850 = vmatmul.mubr.msk.f32.gmra.mrb[4].mxu1 %vm231_vm1, %v2124_v20  ;;  %v2692_v29 = vsel %vm2676_vm6, %v3612_v18, %v2684_v23  ;;  %vm2871_vm6 = vcmp.gt.f32.partialorder %v3635_v1, 0.0  ;;  %v3651_v23 = vld [vmem:[%s4226_s25 + $0x1f1] sm:$0xff] }
  0x3f   : > { %3962 = vmatmul.mubr.msk.f32.gmra.mrb[4].mxu0 %vm231_vm1, %v2125_v25  ;;  %3852 = vmatprep.mubr.msk.f32.mxu1 %vm231_vm1, %v2125_v25  ;;  %v3614_v25 = vld [vmem:[%s4226_s25 + $0x1e0] sm:$0xff]  ;;  %vm3059_vm12 = vcmp.gt.f32.partialorder %v3651_v23, 0.0 }
  0x40   : > { %3964 = vmatprep.mubr.msk.f32.mxu0 %vm231_vm1, %v2126_v27  ;;  %v2686_v31 = vmul.f32 0.2, %v3614_v25  ;;  %vm2678_vm8 = vcmp.gt.f32.partialorder %v3614_v25, 0.0 }
  0x42   : > { %3853 = vmatmul.mubr.msk.f32.gmra.mrb[6].mxu1 %vm231_vm1, %v2126_v27  ;;  %v2685_v27 = vmul.f32 0.2, %v3613_v24  ;;  %v2694_v37 = vsel %vm2678_vm8, %v3614_v25, %v2686_v31  ;;  %vm1532_vm8 = vcmp.gt.f32.partialorder %v3504_v9, 0.0 }
  0x43   : > { %3965 = vmatmul.mubr.msk.f32.gmra.mrb[6].mxu0 %vm231_vm1, %v2127_v32  ;;  %3857 = vmatprep.mubr.msk.f32.mxu1 %vm231_vm1, %v786_v34  ;;  %v3616_v32 = vld [vmem:[%s4226_s25 + $0x200] sm:$0xff]  ;;  %v2687_v34 = vmul.f32 0.2, %v3615_v30 }
  0x44   : > { %3969 = vmatprep.mubr.msk.f32.mxu0 %vm231_vm1, %v2310_v35  ;;  %v2693_v33 = vsel %vm2677_vm7, %v3613_v24, %v2685_v27  ;;  %vm2680_vm10 = vcmp.gt.f32.partialorder %v3616_v32, 0.0  ;;  %vm2872_vm7 = vcmp.gt.f32.partialorder %v3636_v3, 0.0  ;;  %v3652_v24 = vld [vmem:[%s4226_s25 + $0x201] sm:$0xff] }
  0x45   : > { %v2695_v41 = vsel %vm2679_vm9, %v3615_v30, %v2687_v34  ;;  %v2888_v13 = vsel %vm2872_vm7, %v3636_v3, %v2880_v7  ;;  %v3654_v30 = vld [vmem:[%s4226_s25 + $0x221] sm:$0xff] }
  0x46   : > { %3858 = vmatmul.mubr.msk.f32.vlgmr.msra.gmra.mrb[0].mxu1 %vm231_vm1, %v2310_v35  ;;  %v2688_v35 = vmul.f32 0.2, %v3616_v32  ;;  %v3070_v34 = vmul.f32 0.2, %v3654_v30 }
  0x47   : > { %3970 = vmatmul.mubr.msk.f32.vlgmr.msra.gmra.mrb[0].mxu0 %vm231_vm1, %v2311_v39  ;;  %3870 = vmatpush3.msk.msra.mxu1 %vm256_vm0, %v3458_v16  ;;  %v3601_v16 = vld [vmem:[%s4226_s25 + $0x1a0] sm:$0xff] }
  0x48   : > { %3982 = vmatpush3.msk.msra.mxu0 %vm256_vm0, %v3602_v17  ;;  %3860 = vmatprep.mubr.msk.f32.mxu1 %vm231_vm1, %v2311_v39  ;;  %v3468_v17 = vld [vmem:[%s4226_s25 + $0x1b0] sm:$0xff]  ;;  %v2500_v20 = vmul.f32 0.2, %v3601_v16  ;;  %vm2492_vm4 = vcmp.gt.f32.partialorder %v3601_v16, 0.0  ;;  %v3512_v39 = vld [vmem:[%s4512_s1 + $0x1c] sm:$0xf] }
  0x49   : > { %3972 = vmatprep.mubr.msk.f32.mxu0 %vm231_vm1, %v2312_v43  ;;  %3883 = vmatprep.subr.msk.mxu1 %vm256_vm0, %v3476_v45  ;;  %v1160_v22 = vmul.f32 0.2, %v3468_v17  ;;  %vm1152_vm5 = vcmp.gt.f32.partialorder %v3468_v17, 0.0 }
  0x4a   : > { %3995 = vmatprep.subr.msk.mxu0 %vm256_vm0, %v3620_v46  ;;  %3861 = vmatmul.mubr.msk.f32.gmra.mrb[2].mxu1 %vm231_vm1, %v2312_v43  ;;  %v2508_v26 = vsel %vm2492_vm4, %v3601_v16, %v2500_v20  ;;  %v2696_v43 = vsel %vm2680_vm10, %v3616_v32, %v2688_v35  ;;  %vm2869_vm4 = vcmp.gt.f32.partialorder %v3633_v59, 0.0  ;;  %v3649_v16 = vld [vmem:[%s4226_s25 + $0x1d1] sm:$0xff] }
  0x4b   : > { %3973 = vmatmul.mubr.msk.f32.gmra.mrb[2].mxu0 %vm231_vm1, %v2313_v47  ;;  %3863 = vmatprep.mubr.msk.f32.mxu1 %vm231_vm1, %v2313_v47  ;;  %v1168_v28 = vsel %vm1152_vm5, %v3468_v17, %v1160_v22  ;;  %v3630_v47 = vld [vmem:[%s4226_s25 + $0x131] sm:$0xff]  ;;  %v3650_v17 = vld [vmem:[%s4226_s25 + $0x1e1] sm:$0xff]  ;;  %vm3057_vm10 = vcmp.gt.f32.partialorder %v3649_v16, 0.0 }
  0x4c   : > { %3975 = vmatprep.mubr.msk.f32.mxu0 %vm231_vm1, %v2314_v49  ;;  %v2874_v52 = vmul.f32 0.2, %v3630_v47  ;;  %vm2866_vm15 = vcmp.gt.f32.partialorder %v3630_v47, 0.0  ;;  %v3066_v22 = vmul.f32 0.2, %v3650_v17  ;;  %vm3058_vm11 = vcmp.gt.f32.partialorder %v3650_v17, 0.0 }
  0x4d   : > { %v3655_v35 = vld [vmem:[%s4226_s25 + $0x231] sm:$0xff] }
  0x4e   : > { %3864 = vmatmul.mubr.msk.f32.gmra.mrb[4].mxu1 %vm231_vm1, %v2314_v49  ;;  %v2882_v58 = vsel %vm2866_vm15, %v3630_v47, %v2874_v52  ;;  %v3074_v27 = vsel %vm3058_vm11, %v3650_v17, %v3066_v22  ;;  %vm3062_vm15 = vcmp.gt.f32.partialorder %v3654_v30, 0.0 }
  0x4f   : > { %3976 = vmatmul.mubr.msk.f32.gmra.mrb[4].mxu0 %vm231_vm1, %v2315_v54  ;;  %3866 = vmatprep.mubr.msk.f32.mxu1 %vm231_vm1, %v2315_v54  ;;  %v3632_v54 = vld [vmem:[%s4226_s25 + $0x151] sm:$0xff]  ;;  %v3078_v38 = vsel %vm3062_vm15, %v3654_v30, %v3070_v34 }
  0x50   : > { %3978 = vmatprep.mubr.msk.f32.mxu0 %vm231_vm1, %v2316_v56  ;;  %v2876_v60 = vmul.f32 0.2, %v3632_v54  ;;  %vm2868_vm3 = vcmp.gt.f32.partialorder %v3632_v54, 0.0 }
  0x52   : > { %3867 = vmatmul.mubr.msk.f32.gmra.mrb[6].mxu1 %vm231_vm1, %v2316_v56  ;;  %v2875_v56 = vmul.f32 0.2, %v3631_v53  ;;  %v2884_v2 = vsel %vm2868_vm3, %v3632_v54, %v2876_v60 }
  0x53   : > { %3979 = vmatmul.mubr.msk.f32.gmra.mrb[6].mxu0 %vm231_vm1, %v2317_v61  ;;  %3871 = vmatprep.mubr.msk.f32.mxu1 %vm231_vm1, %v977_v63  ;;  %v3634_v61 = vld [vmem:[%s4226_s25 + $0x171] sm:$0xff]  ;;  %v2877_v63 = vmul.f32 0.2, %v3633_v59 }
  0x54   : > { %3983 = vmatprep.mubr.msk.f32.mxu0 %vm231_vm1, %v2501_v0  ;;  %v2883_v62 = vsel %vm2867_vm2, %v3631_v53, %v2875_v56  ;;  %vm2870_vm5 = vcmp.gt.f32.partialorder %v3634_v61, 0.0  ;;  %vm3063_vm2 = vcmp.gt.f32.partialorder %v3655_v35, 0.0 }
  0x56   : > { %3872 = vmatmul.mubr.msk.f32.vlgmr.msra.gmra.mrb[0].mxu1 %vm231_vm1, %v2501_v0  ;;  %v2878_v0 = vmul.f32 0.2, %v3634_v61 }
  0x57   : > { %3984 = vmatmul.mubr.msk.f32.vlgmr.msra.gmra.mrb[0].mxu0 %vm231_vm1, %v2502_v4  ;;  %3884 = vmatpush3.msk.msra.mxu1 %vm256_vm0, %v3476_v45  ;;  %v3619_v45 = vld [vmem:[%s4226_s25 + $0x230] sm:$0xff] }
  0x58   : > { %3996 = vmatpush3.msk.msra.mxu0 %vm256_vm0, %v3620_v46  ;;  %3874 = vmatprep.mubr.msk.f32.mxu1 %vm231_vm1, %v2502_v4  ;;  %v3486_v46 = vld [vmem:[%s4226_s25 + $0x121] sm:$0xff]  ;;  %v2691_v49 = vmul.f32 0.2, %v3619_v45  ;;  %vm2683_vm13 = vcmp.gt.f32.partialorder %v3619_v45, 0.0  ;;  %v2885_v4 = vsel %vm2869_vm4, %v3633_v59, %v2877_v63  ;;  %v2886_v6 = vsel %vm2870_vm5, %v3634_v61, %v2878_v0 }
  0x59   : > { %3986 = vmatprep.mubr.msk.f32.mxu0 %vm231_vm1, %v2503_v8  ;;  %3897 = vmatprep.subr.msk.mxu1 %vm256_vm0, %v3494_v10  ;;  %v1350_v51 = vmul.f32 0.2, %v3486_v46  ;;  %vm1342_vm14 = vcmp.gt.f32.partialorder %v3486_v46, 0.0 }
  0x5a   : > { %4009 = vmatprep.subr.msk.mxu0 %vm256_vm0, %v3638_v11  ;;  %3875 = vmatmul.mubr.msk.f32.gmra.mrb[2].mxu1 %vm231_vm1, %v2503_v8  ;;  %v2699_v55 = vsel %vm2683_vm13, %v3619_v45, %v2691_v49  ;;  %v3637_v8 = vld [vmem:[%s4226_s25 + $0x1a1] sm:$0xff]  ;;  %vm3060_vm13 = vcmp.gt.f32.partialorder %v3652_v24, 0.0 }
  0x5b   : > { %3987 = vmatmul.mubr.msk.f32.gmra.mrb[2].mxu0 %vm231_vm1, %v2504_v12  ;;  %3877 = vmatprep.mubr.msk.f32.mxu1 %vm231_vm1, %v2504_v12  ;;  %v1358_v57 = vsel %vm1342_vm14, %v3486_v46, %v1350_v51  ;;  %v2881_v12 = vmul.f32 0.2, %v3637_v8 }
  0x5c   : > { %3989 = vmatprep.mubr.msk.f32.mxu0 %vm231_vm1, %v2505_v14 }
  0x5e   : > { %3878 = vmatmul.mubr.msk.f32.gmra.mrb[4].mxu1 %vm231_vm1, %v2505_v14  ;;  %v1540_v14 = vmul.f32 0.2, %v3504_v9 }
  0x5f   : > { %3990 = vmatmul.mubr.msk.f32.gmra.mrb[4].mxu0 %vm231_vm1, %v2506_v19  ;;  %3880 = vmatprep.mubr.msk.f32.mxu1 %vm231_vm1, %v2506_v19  ;;  %v3065_v19 = vmul.f32 0.2, %v3649_v16 }
  0x60   : > { %3992 = vmatprep.mubr.msk.f32.mxu0 %vm231_vm1, %v2507_v21  ;;  %v1548_v20 = vsel %vm1532_vm8, %v3504_v9, %v1540_v14 }
  0x61   : > { %v3073_v25 = vsel %vm3057_vm10, %v3649_v16, %v3065_v19 }
  0x62   : > { %3881 = vmatmul.mubr.msk.f32.gmra.mrb[6].mxu1 %vm231_vm1, %v2507_v21 }
  0x63   : > { %3993 = vmatmul.mubr.msk.f32.gmra.mrb[6].mxu0 %vm231_vm1, %v2508_v26  ;;  %3885 = vmatprep.mubr.msk.f32.mxu1 %vm231_vm1, %v1168_v28  ;;  %v3067_v26 = vmul.f32 0.2, %v3651_v23  ;;  %v3068_v28 = vmul.f32 0.2, %v3652_v24 }
  0x64   : > { %3997 = vmatprep.mubr.msk.f32.mxu0 %vm231_vm1, %v2692_v29 }
  0x65   : > { %v3075_v31 = vsel %vm3059_vm12, %v3651_v23, %v3067_v26 }
  0x66   : > { %3886 = vmatmul.mubr.msk.f32.vlgmr.msra.gmra.mrb[0].mxu1 %vm231_vm1, %v2692_v29  ;;  %v3653_v29 = vld [vmem:[%s4226_s25 + $0x211] sm:$0xff] }
  0x67   : > { %3998 = vmatmul.mubr.msk.f32.vlgmr.msra.gmra.mrb[0].mxu0 %vm231_vm1, %v2693_v33  ;;  %3898 = vmatpush3.msk.msra.mxu1 %vm256_vm0, %v3494_v10  ;;  %v3648_v10 = vld [vmem:[%s4226_s25 + $0x1c1] sm:$0xff]  ;;  %v3069_v32 = vmul.f32 0.2, %v3653_v29  ;;  %vm3061_vm14 = vcmp.gt.f32.partialorder %v3653_v29, 0.0  ;;  %s3668_s25 = sshll.u32 %s4516_s13, 6 }
  0x68   : > { %4010 = vmatpush3.msk.msra.mxu0 %vm256_vm0, %v3638_v11  ;;  %3888 = vmatprep.mubr.msk.f32.mxu1 %vm231_vm1, %v2693_v33  ;;  %v2887_v11 = vsel %vm2871_vm6, %v3635_v1, %v2879_v5  ;;  %v3064_v15 = vmul.f32 0.2, %v3648_v10  ;;  %vm3056_vm9 = vcmp.gt.f32.partialorder %v3648_v10, 0.0  ;;  %v3076_v33 = vsel %vm3060_vm13, %v3652_v24, %v3068_v28  ;;  %s4494_s28 = scalar_lea.vmem %s4513_s2, %s3668_s25 }
  0x69   : > { %4000 = vmatprep.mubr.msk.f32.mxu0 %vm231_vm1, %v2694_v37  ;;  %3911 = vmatprep.subr.msk.mxu1 %vm256_vm0, %v3512_v39  ;;  %v3077_v36 = vsel %vm3061_vm14, %v3653_v29, %v3069_v32 }
  0x6a   : > { %4023 = vmatprep.subr.msk.mxu0 %vm256_vm0, %v3656_v40  ;;  %3889 = vmatmul.mubr.msk.f32.gmra.mrb[2].mxu1 %vm231_vm1, %v2694_v37  ;;  %v3072_v21 = vsel %vm3056_vm9, %v3648_v10, %v3064_v15  ;;  %v3071_v37 = vmul.f32 0.2, %v3655_v35 }
  0x6b   : > { %4001 = vmatmul.mubr.msk.f32.gmra.mrb[2].mxu0 %vm231_vm1, %v2695_v41  ;;  %3891 = vmatprep.mubr.msk.f32.mxu1 %vm231_vm1, %v2695_v41 }
  0x6c   : > { %4003 = vmatprep.mubr.msk.f32.mxu0 %vm231_vm1, %v2696_v43 }
  0x6e   : > { %3892 = vmatmul.mubr.msk.f32.gmra.mrb[4].mxu1 %vm231_vm1, %v2696_v43 }
  0x6f   : > { %4004 = vmatmul.mubr.msk.f32.gmra.mrb[4].mxu0 %vm231_vm1, %v2697_v48  ;;  %3894 = vmatprep.mubr.msk.f32.mxu1 %vm231_vm1, %v2697_v48 }
  0x70   : > { %4006 = vmatprep.mubr.msk.f32.mxu0 %vm231_vm1, %v2698_v50 }
  0x72   : > { %3895 = vmatmul.mubr.msk.f32.gmra.mrb[6].mxu1 %vm231_vm1, %v2698_v50 }
  0x73   : > { %4007 = vmatmul.mubr.msk.f32.gmra.mrb[6].mxu0 %vm231_vm1, %v2699_v55  ;;  %3899 = vmatprep.mubr.msk.f32.mxu1 %vm231_vm1, %v1358_v57 }
  0x74   : > { %4011 = vmatprep.mubr.msk.f32.mxu0 %vm231_vm1, %v2882_v58 }
  0x76   : > { %3900 = vmatmul.mubr.msk.f32.vlgmr.msra.gmra.mrb[0].mxu1 %vm231_vm1, %v2882_v58 }
  0x77   : > { %4012 = vmatmul.mubr.msk.f32.vlgmr.msra.gmra.mrb[0].mxu0 %vm231_vm1, %v2883_v62  ;;  %3912 = vmatpush3.msk.msra.mxu1 %vm256_vm0, %v3512_v39  ;;  %v3079_v39 = vsel %vm3063_vm2, %v3655_v35, %v3071_v37 }
  0x78   : > { %4024 = vmatpush3.msk.msra.mxu0 %vm256_vm0, %v3656_v40  ;;  %3902 = vmatprep.mubr.msk.f32.mxu1 %vm231_vm1, %v2883_v62  ;;  %vm2873_vm0 = vcmp.gt.f32.partialorder %v3637_v8, 0.0 }
  0x79   : > { %4014 = vmatprep.mubr.msk.f32.mxu0 %vm231_vm1, %v2884_v2  ;;  %v2889_v18 = vsel %vm2873_vm0, %v3637_v8, %v2881_v12 }
  0x7a   : > { %3903 = vmatmul.mubr.msk.f32.gmra.mrb[2].mxu1 %vm231_vm1, %v2884_v2 }
  0x7b   : > { %4015 = vmatmul.mubr.msk.f32.gmra.mrb[2].mxu0 %vm231_vm1, %v2885_v4  ;;  %3905 = vmatprep.mubr.msk.f32.mxu1 %vm231_vm1, %v2885_v4 }
  0x7c   : > { %4017 = vmatprep.mubr.msk.f32.mxu0 %vm231_vm1, %v2886_v6 }
  0x7e   : > { %3906 = vmatmul.mubr.msk.f32.gmra.mrb[4].mxu1 %vm231_vm1, %v2886_v6 }
  0x7f   : > { %4018 = vmatmul.mubr.msk.f32.gmra.mrb[4].mxu0 %vm231_vm1, %v2887_v11  ;;  %3908 = vmatprep.mubr.msk.f32.mxu1 %vm231_vm1, %v2887_v11 }
  0x80   : > { %4020 = vmatprep.mubr.msk.f32.mxu0 %vm231_vm1, %v2888_v13 }
  0x82   : > { %3909 = vmatmul.mubr.msk.f32.gmra.mrb[6].mxu1 %vm231_vm1, %v2888_v13 }
  0x83   : > { %4021 = vmatmul.mubr.msk.f32.gmra.mrb[6].mxu0 %vm231_vm1, %v2889_v18  ;;  %3913 = vmatprep.mubr.msk.f32.mxu1 %vm231_vm1, %v1548_v20 }
  0x84   : > { %4025 = vmatprep.mubr.msk.f32.mxu0 %vm231_vm1, %v3072_v21 }
  0x86   : > { %3914 = vmatmul.mubr.msk.f32.vlgmr.msra.gmra.mrb[0].mxu1 %vm231_vm1, %v3072_v21 }
  0x87   : > { %4026 = vmatmul.mubr.msk.f32.vlgmr.msra.gmra.mrb[0].mxu0 %vm231_vm1, %v3073_v25  ;;  %3916 = vmatprep.mubr.msk.f32.mxu1 %vm231_vm1, %v3073_v25 }
  0x88   : > { %4028 = vmatprep.mubr.msk.f32.mxu0 %vm231_vm1, %v3074_v27 }
  0x8a   : > { %3917 = vmatmul.mubr.msk.f32.gmra.mrb[2].mxu1 %vm231_vm1, %v3074_v27 }
  0x8b   : > { %4029 = vmatmul.mubr.msk.f32.gmra.mrb[2].mxu0 %vm231_vm1, %v3075_v31  ;;  %3919 = vmatprep.mubr.msk.f32.mxu1 %vm231_vm1, %v3075_v31 }
  0x8c   : > { %4031 = vmatprep.mubr.msk.f32.mxu0 %vm231_vm1, %v3076_v33 }
  0x8e   : > { %3920 = vmatmul.mubr.msk.f32.gmra.mrb[4].mxu1 %vm231_vm1, %v3076_v33 }
  0x8f   : > { %4032 = vmatmul.mubr.msk.f32.gmra.mrb[4].mxu0 %vm231_vm1, %v3077_v36  ;;  %3922 = vmatprep.mubr.msk.f32.mxu1 %vm231_vm1, %v3077_v36 }
  0x90   : > { %4034 = vmatprep.mubr.msk.f32.mxu0 %vm231_vm1, %v3078_v38 }
  0x92   : > { %3923 = vmatmul.mubr.msk.f32.gmra.mrb[6].mxu1 %vm231_vm1, %v3078_v38 }
  0x93   : > { %4035 = vmatmul.mubr.msk.f32.gmra.mrb[6].mxu0 %vm231_vm1, %v3079_v39  ;;  %vm3297_vm1 = vcmask 1040384  }
 0x159   : > { %v3915_v40 = vpop.f32.mrb[0].mxu1 }
 0x15a   : > { %v4027_v41 = vpop.f32.mrb[0].mxu0  ;;  %v1659_v43 = vpop.f32.mrb[1].mxu1 }
 0x15b   : > { %v4037_v42 = vadd.f32 %v4027_v41, %v3915_v40  ;;  %v3183_v44 = vpop.f32.mrb[1].mxu0 }
 0x15c   : > { %v4038_v45 = vadd.f32 %v3183_v44, %v1659_v43 }
 0x15d   : > { %3247 = vst [vmem:[%s4494_s28 + $0x8] sm:$0xff] %v4037_v42  ;;  %v3918_v47 = vpop.f32.mrb[2].mxu1 }
 0x15e   : > { %3246 = vst [vmem:[%s4494_s28] sm:$0xff] %v4038_v45  ;;  %v3254_v46 = vadd.f32 %v4038_v45, %v4037_v42  ;;  %v4030_v48 = vpop.f32.mrb[2].mxu0  ;;  %v1669_v50 = vpop.f32.mrb[3].mxu1 }
 0x15f   : > { %v4039_v49 = vadd.f32 %v4030_v48, %v3918_v47  ;;  %v3193_v51 = vpop.f32.mrb[3].mxu0 }
 0x160   : > { %v4040_v52 = vadd.f32 %v3193_v51, %v1669_v50 }
 0x161   : > { %3249 = vst [vmem:[%s4494_s28 + $0x18] sm:$0xff] %v4039_v49  ;;  %v3921_v54 = vpop.f32.mrb[4].mxu1 }
 0x162   : > { %3248 = vst [vmem:[%s4494_s28 + $0x10] sm:$0xff] %v4040_v52  ;;  %v3255_v53 = vadd.f32 %v4040_v52, %v3254_v46  ;;  %v4033_v55 = vpop.f32.mrb[4].mxu0  ;;  %v1679_v57 = vpop.f32.mrb[5].mxu1 }
 0x163   : > { %v4041_v56 = vadd.f32 %v4033_v55, %v3921_v54  ;;  %v3203_v58 = vpop.f32.mrb[5].mxu0 }
 0x164   : > { %v4042_v59 = vadd.f32 %v3203_v58, %v1679_v57  ;;  %v3256_v60 = vadd.f32 %v4039_v49, %v3255_v53 }
 0x165   : > { %3251 = vst [vmem:[%s4494_s28 + $0x28] sm:$0xff] %v4041_v56  ;;  %v3924_v62 = vpop.f32.mrb[6].mxu1 }
 0x166   : > { %3250 = vst [vmem:[%s4494_s28 + $0x20] sm:$0xff] %v4042_v59  ;;  %v3257_v61 = vadd.f32 %v4042_v59, %v3256_v60  ;;  %v4036_v63 = vpop.f32.mrb[6].mxu0  ;;  %v1689_v1 = vpop.f32.mrb[7].mxu1 }
 0x167   : > { %v4043_v0 = vadd.f32 %v4036_v63, %v3924_v62  ;;  %v3213_v2 = vpop.f32.mrb[7].mxu0 }
 0x168   : > { %v4044_v3 = vadd.f32 %v3213_v2, %v1689_v1  ;;  %v3258_v4 = vadd.f32 %v4041_v56, %v3257_v61 }
 0x169   : > { %3253 = vst [vmem:[%s4494_s28 + $0x38] sm:$0xff] %v4043_v0 }
 0x16a   : > { %3252 = vst [vmem:[%s4494_s28 + $0x30] sm:$0xff] %v4044_v3  ;;  %v3259_v5 = vadd.f32 %v4044_v3, %v3258_v4 }
 0x16c   : > { %v3260_v6 = vadd.f32 %v4043_v0, %v3259_v5 }
 0x16e   : > { %v3261_v7 = vrot.slane %v3260_v6, 4 }
 0x170   : > { %v3262_v8 = vadd.f32 %v3261_v7, %v3260_v6 }
 0x172   : > { %v3263_v9 = vrot.slane %v3262_v8, 2 }
 0x174   : > { %v3264_v10 = vadd.f32 %v3263_v9, %v3262_v8 }
 0x176   : > { %v3265_v11 = vrot.slane %v3264_v10, 1 }
 0x178   : > { %v3266_v12 = vadd.f32 %v3265_v11, %v3264_v10 }
 0x17a   : > { %v3267_v13 = vmul.f32 0.015625, %v3266_v12 }
 0x17c   : > { %v3268_v14 = vsub.f32 %v4038_v45, %v3267_v13  ;;  %v3269_v15 = vsub.f32 %v4037_v42, %v3267_v13  ;;  %v3270_v16 = vsub.f32 %v4040_v52, %v3267_v13  ;;  %v3271_v17 = vsub.f32 %v4039_v49, %v3267_v13 }
 0x17d   : > { %v3272_v18 = vsub.f32 %v4042_v59, %v3267_v13  ;;  %v3273_v19 = vsub.f32 %v4041_v56, %v3267_v13  ;;  %v3274_v20 = vsub.f32 %v4044_v3, %v3267_v13  ;;  %v3275_v21 = vsub.f32 %v4043_v0, %v3267_v13 }
 0x17e   : > { %v3276_v22 = vmul.f32 %v3268_v14, %v3268_v14  ;;  %v3277_v23 = vmul.f32 %v3269_v15, %v3269_v15  ;;  %v3278_v24 = vmul.f32 %v3270_v16, %v3270_v16  ;;  %v3279_v26 = vmul.f32 %v3271_v17, %v3271_v17 }
 0x17f   : > { %v3280_v28 = vmul.f32 %v3272_v18, %v3272_v18  ;;  %v3281_v30 = vmul.f32 %v3273_v19, %v3273_v19  ;;  %v3282_v32 = vmul.f32 %v3274_v20, %v3274_v20  ;;  %v3283_v34 = vmul.f32 %v3275_v21, %v3275_v21 }
 0x180   : > { %v3284_v25 = vadd.f32 %v3277_v23, %v3276_v22 }
 0x182   : > { %v3285_v27 = vadd.f32 %v3284_v25, %v3278_v24 }
 0x184   : > { %v3286_v29 = vadd.f32 %v3285_v27, %v3279_v26 }
 0x186   : > { %v3287_v31 = vadd.f32 %v3286_v29, %v3280_v28 }
 0x188   : > { %v3288_v33 = vadd.f32 %v3287_v31, %v3281_v30 }
 0x18a   : > { %v3289_v35 = vadd.f32 %v3288_v33, %v3282_v32 }
 0x18c   : > { %v3290_v36 = vadd.f32 %v3289_v35, %v3283_v34 }
 0x18e   : > { %v3291_v37 = vrot.slane %v3290_v36, 4 }
 0x190   : > { %v3292_v38 = vadd.f32 %v3291_v37, %v3290_v36 }
 0x192   : > { %v3293_v39 = vrot.slane %v3292_v38, 2 }
 0x194   : > { %v3294_v40 = vadd.f32 %v3293_v39, %v3292_v38 }
 0x196   : > { %v3295_v41 = vrot.slane %v3294_v40, 1 }
 0x198   : > { %v3296_v42 = vadd.f32 %v3295_v41, %v3294_v40 }
 0x19a   : > { %v3298_v43 = vsel %vm3297_vm1, %v3266_v12, %v3296_v42 }
 0x19b   : > { %3299 = vst [vmem:[%s181_s5] sm:$0x3] %v3298_v43 }
 0x19c PF: > { %s14_s12 = sadd.s32 1, %s4172_s12  }
 0x19d   : > { %p11_p4 = scmp.ge.s32.totalorder %s14_s12, 4  }
 0x19f   :  { %13 = sbr.rel (!%p11_p4) target bundleno = 1 (0x1), region = 92 }

</bundles_post_ra>
